<compile_context>
chip_gen: v6e
topology: v6e:2x2x1
jax: 0.10.0
libtpu: 0.0.40
codegen_flags: <defaults>
</compile_context>

<pallas_src>
import math

import jax
import jax.numpy as jnp
from jax.experimental import pallas as pl
from jax.experimental.pallas import tpu as pltpu


def simple_nn_kernel(x_ref, w1_ref, b1_ref, w2_ref, b2_ref, o_ref):
    # Streamed activations arrive in their original dtype; cast to bf16 at the
    # point of use (MXU operand dtype).  Contraction dims may be < 128; Mosaic
    # masks the short contraction on the MXU.
    x = x_ref[...].astype(jnp.bfloat16)
    # First linear layer: bf16 x bf16 -> f32 accumulate on the MXU.
    h = jnp.dot(x, w1_ref[...], preferred_element_type=jnp.float32)
    # Bias + ReLU in f32 on the VPU (b1 is [1, hid] -> broadcasts over batch).
    h = jnp.maximum(h + b1_ref[...], 0.0)
    # Second linear layer: activations back to bf16 for the MXU.
    y = jnp.dot(h.astype(jnp.bfloat16), w2_ref[...],
                preferred_element_type=jnp.float32)
    o_ref[...] = (y + b2_ref[...]).astype(o_ref.dtype)


def _round_up(n, m):
    return ((n + m - 1) // m) * m


def _cdiv(a, b):
    return -(-a // b)


def prepare_simple_nn_params(w1, b1, w2, b2):
    """One-time parameter prep, hoisted out of the per-call path.

    Weights go to bf16 (MXU operand dtype); biases stay f32 and are reshaped to
    (1, dim) rows so they broadcast over the batch tile inside the kernel.  No
    padding is needed: the weight/bias blocks cover their full arrays, which
    are exempt from the (8, 128) block-shape rule.
    """
    return (w1.astype(jnp.bfloat16),
            b1.reshape(1, -1).astype(jnp.float32),
            w2.astype(jnp.bfloat16),
            b2.reshape(1, -1).astype(jnp.float32))


def simple_nn_forward(x, params, *, batch_tile=None, single_buffer_weights=True):
    """Fused MLP forward: relu(x @ w1 + b1) @ w2 + b2.

    `params` must come from prepare_simple_nn_params().  The batch is tiled
    into ~`batch_tile`-row grid steps; weights/biases stay VMEM-resident across
    all steps.  Default: a single step for batches up to 4096 rows (per-step
    overhead dominates at these layer sizes); on v7x with large batches pass
    batch_tile=64..128 so each TensorCore gets >=4 pipelined steps.
    """
    w1, b1, w2, b2 = params
    batch, in_dim = x.shape
    hid_dim = w1.shape[1]
    out_dim = w2.shape[1]

    SUB = 8  # f32 sublane granularity for the batch (second-to-last) axis.
    if batch_tile is None:
        batch_tile = batch if batch <= 4096 else 1024
    batch_tile = max(int(batch_tile), SUB)

    # Pick tb so the last tile is (nearly) full: waste < 8 rows, not < tile-1.
    n_steps = max(1, _cdiv(batch, batch_tile))
    tb = _round_up(_cdiv(batch, n_steps), SUB)
    n_steps = _cdiv(batch, tb)
    batch_p = n_steps * tb

    # Only the batch axis is padded; padded rows are sliced off at the end and
    # are mathematically inert for the returned rows.
    xp = x if batch_p == batch else jnp.pad(x, ((0, batch_p - batch), (0, 0)))

    grid = (n_steps,)

    cost = pl.CostEstimate(
        flops=2 * batch_p * (in_dim * hid_dim + hid_dim * out_dim),
        transcendentals=0,
        bytes_accessed=(xp.size * xp.dtype.itemsize
                        + w1.size * 2 + w2.size * 2
                        + b1.size * 4 + b2.size * 4
                        + batch_p * out_dim * 4),
    )

    # VMEM budget: streamed x/out tiles are double-buffered; count the resident
    # weights twice as well so the limit is safe even if single-buffering is
    # unavailable.  Keeps large layers compiling inside v7x's 64 MiB VMEM.
    footprint = (2 * tb * in_dim * xp.dtype.itemsize
                 + 2 * tb * out_dim * 4
                 + 2 * (w1.size * 2 + w2.size * 2 + b1.size * 4 + b2.size * 4))
    vmem_limit = int(min(100 * 2**20, max(32 * 2**20, 2 * footprint)))

    def _build(use_single_buffer):
        def resident(shape):
            index_map = lambda i, _shape=shape: (0,) * len(_shape)
            if use_single_buffer:
                # Constant index_map -> the block never changes; one buffer is
                # enough (halves the resident VMEM footprint).
                return pl.BlockSpec(shape, index_map,
                                    pipeline_mode=pl.Buffered(1))
            return pl.BlockSpec(shape, index_map)

        return pl.pallas_call(
            simple_nn_kernel,
            out_shape=jax.ShapeDtypeStruct((batch_p, out_dim), jnp.float32),
            grid_spec=pltpu.PrefetchScalarGridSpec(
                num_scalar_prefetch=0,
                grid=grid,
                in_specs=[
                    # Activations: one (tb, in_dim) tile per step (pipelined).
                    pl.BlockSpec((tb, in_dim), lambda i: (i, 0)),
                    # Weights / biases: same block every step -> VMEM-resident.
                    resident((in_dim, hid_dim)),
                    resident((1, hid_dim)),
                    resident((hid_dim, out_dim)),
                    resident((1, out_dim)),
                ],
                out_specs=pl.BlockSpec((tb, out_dim), lambda i: (i, 0)),
            ),
            compiler_params=pltpu.CompilerParams(
                # Independent batch tiles -> shard across TensorCores on v7x.
                dimension_semantics=("parallel",),
                vmem_limit_bytes=vmem_limit,
            ),
            cost_estimate=cost,
        )

    if single_buffer_weights:
        try:
            out = _build(True)(xp, w1, b1, w2, b2)
        except Exception:
            # Fallback for jax versions where BlockSpec.pipeline_mode /
            # Buffered(1) is not supported by the TPU lowering.
            out = _build(False)(xp, w1, b1, w2, b2)
    else:
        out = _build(False)(xp, w1, b1, w2, b2)

    return out if batch_p == batch else out[:batch]


def init_linear_params(key, in_features, out_features):
    """Deterministic init matching torch.nn.Linear's default:
    W, b ~ U(-1/sqrt(in_features), 1/sqrt(in_features)).
    Stored as [in, out] (transposed vs. PyTorch) for x @ W."""
    kw, kb = jax.random.split(key)
    bound = 1.0 / math.sqrt(in_features)
    w = jax.random.uniform(
        kw, (in_features, out_features), jnp.float32, minval=-bound, maxval=bound
    )
    b = jax.random.uniform(
        kb, (out_features,), jnp.float32, minval=-bound, maxval=bound
    )
    return w, b


def _reference_forward(x, w1, b1, w2, b2):
    # Pure-JAX reference with the same bf16-operand / f32-accumulate recipe.
    h = jnp.dot(x.astype(jnp.bfloat16), w1.astype(jnp.bfloat16),
                preferred_element_type=jnp.float32) + b1
    h = jnp.maximum(h, 0.0)
    return jnp.dot(h.astype(jnp.bfloat16), w2.astype(jnp.bfloat16),
                   preferred_element_type=jnp.float32) + b2


if __name__ == "__main__":
    batch, input_dim, hidden_dim, output_dim = 512, 16, 32, 8

    key = jax.random.PRNGKey(0)
    kx, k1, k2 = jax.random.split(key, 3)

    x = jax.random.normal(kx, (batch, input_dim), jnp.float32)
    w1, b1 = init_linear_params(k1, input_dim, hidden_dim)
    w2, b2 = init_linear_params(k2, hidden_dim, output_dim)

    # One-time (per-parameter) prep; the per-call path only streams x.
    params = prepare_simple_nn_params(w1, b1, w2, b2)

    # Default path: single grid step (512 rows fit one tile trivially).
    out = jax.block_until_ready(simple_nn_forward(x, params))
    assert out.shape == (batch, output_dim)

    ref = _reference_forward(x, w1, b1, w2, b2)
    assert jnp.allclose(out, ref, atol=2e-3, rtol=2e-3), float(
        jnp.max(jnp.abs(out - ref)))

    # Full-f32 math differs only by bf16 operand quantization.
    ref_f32 = jnp.maximum(x @ w1 + b1, 0.0) @ w2 + b2
    assert jnp.allclose(out, ref_f32, atol=5e-2, rtol=5e-2)

    # Multi-step grid + ragged batch (exercises batch padding + final slice).
    xr = x[:300]
    out_r = jax.block_until_ready(
        simple_nn_forward(xr, params, batch_tile=128))
    assert out_r.shape == (300, output_dim)
    assert jnp.allclose(out_r, ref[:300], atol=2e-3, rtol=2e-3)

    print("KERNEL_OK")
</pallas_src>

<mosaic_0001>
module attributes {stable_mosaic.version = 11 : i64} {
  func.func @simple_nn_kernel(%arg0: i32, %arg1: memref<512x16xf32, #tpu.memory_space<vmem>>, %arg2: memref<16x32xbf16, #tpu.memory_space<vmem>>, %arg3: memref<1x32xf32, #tpu.memory_space<vmem>>, %arg4: memref<32x8xbf16, #tpu.memory_space<vmem>>, %arg5: memref<1x8xf32, #tpu.memory_space<vmem>>, %arg6: memref<512x8xf32, #tpu.memory_space<vmem>>) attributes {dimension_semantics = [#tpu.dimension_semantics<parallel>], iteration_bounds = array<i64: 1>, scalar_prefetch = 0 : i64, scratch_operands = 0 : i64, tpu.core_type = #tpu.core_type<tc>, window_params = [{transform_indices = @transform_0, window_bounds = array<i64: 512, 16>}, {pipeline_mode = #tpu.pipeline_mode<synchronous>, transform_indices = @transform_1, window_bounds = array<i64: 16, 32>}, {pipeline_mode = #tpu.pipeline_mode<synchronous>, transform_indices = @transform_2, window_bounds = array<i64: 1, 32>}, {pipeline_mode = #tpu.pipeline_mode<synchronous>, transform_indices = @transform_3, window_bounds = array<i64: 32, 8>}, {pipeline_mode = #tpu.pipeline_mode<synchronous>, transform_indices = @transform_4, window_bounds = array<i64: 1, 8>}, {transform_indices = @transform_5, window_bounds = array<i64: 512, 8>}]} {
    %c0 = arith.constant 0 : index
    %c0_0 = arith.constant 0 : index
    %0 = vector.load %arg1[%c0, %c0_0] : memref<512x16xf32, #tpu.memory_space<vmem>>, vector<512x16xf32>
    %1 = arith.truncf %0 : vector<512x16xf32> to vector<512x16xbf16>
    %c0_1 = arith.constant 0 : index
    %c0_2 = arith.constant 0 : index
    %2 = vector.load %arg2[%c0_1, %c0_2] : memref<16x32xbf16, #tpu.memory_space<vmem>>, vector<16x32xbf16>
    %cst = arith.constant dense<0.000000e+00> : vector<512x32xf32>
    %3 = tpu.matmul %1, %2, %cst {dimension_numbers = #tpu.dot_dimension_numbers<[1], [0], [0], [1], [0, 0, 1, 1], [], []>} : vector<512x16xbf16>, vector<16x32xbf16>, vector<512x32xf32> -> vector<512x32xf32>
    %c0_3 = arith.constant 0 : index
    %c0_4 = arith.constant 0 : index
    %4 = vector.load %arg3[%c0_3, %c0_4] : memref<1x32xf32, #tpu.memory_space<vmem>>, vector<1x32xf32>
    %5 = vector.broadcast %4 : vector<1x32xf32> to vector<512x32xf32>
    %6 = arith.addf %3, %5 : vector<512x32xf32>
    %cst_5 = arith.constant 0.000000e+00 : f32
    %7 = vector.broadcast %cst_5 : f32 to vector<512x32xf32>
    %8 = arith.maximumf %6, %7 : vector<512x32xf32>
    %9 = arith.truncf %8 : vector<512x32xf32> to vector<512x32xbf16>
    %c0_6 = arith.constant 0 : index
    %c0_7 = arith.constant 0 : index
    %10 = vector.load %arg4[%c0_6, %c0_7] : memref<32x8xbf16, #tpu.memory_space<vmem>>, vector<32x8xbf16>
    %cst_8 = arith.constant dense<0.000000e+00> : vector<512x8xf32>
    %11 = tpu.matmul %9, %10, %cst_8 {dimension_numbers = #tpu.dot_dimension_numbers<[1], [0], [0], [1], [0, 0, 1, 1], [], []>} : vector<512x32xbf16>, vector<32x8xbf16>, vector<512x8xf32> -> vector<512x8xf32>
    %c0_9 = arith.constant 0 : index
    %c0_10 = arith.constant 0 : index
    %12 = vector.load %arg5[%c0_9, %c0_10] : memref<1x8xf32, #tpu.memory_space<vmem>>, vector<1x8xf32>
    %13 = vector.broadcast %12 : vector<1x8xf32> to vector<512x8xf32>
    %14 = arith.addf %11, %13 : vector<512x8xf32>
    %c0_11 = arith.constant 0 : index
    %c0_12 = arith.constant 0 : index
    %15 = vector.load %arg6[%c0_11, %c0_12] : memref<512x8xf32, #tpu.memory_space<vmem>>, vector<512x8xf32>
    tpu.vector_store %arg6[%c0_11, %c0_12], %14 {strides = array<i32>} : memref<512x8xf32, #tpu.memory_space<vmem>>, vector<512x8xf32>,
    return
  }
  func.func @transform_0(%arg0: i32) -> (i32, i32) {
    %c0_i32 = arith.constant 0 : i32
    %c0_i32_0 = arith.constant 0 : i32
    return %arg0, %c0_i32 : i32, i32
  }
  func.func @transform_1(%arg0: i32) -> (i32, i32) {
    %c0_i32 = arith.constant 0 : i32
    %c0_i32_0 = arith.constant 0 : i32
    %c0_i32_1 = arith.constant 0 : i32
    return %c0_i32, %c0_i32_0 : i32, i32
  }
  func.func @transform_2(%arg0: i32) -> (i32, i32) {
    %c0_i32 = arith.constant 0 : i32
    %c0_i32_0 = arith.constant 0 : i32
    %c0_i32_1 = arith.constant 0 : i32
    return %c0_i32, %c0_i32_0 : i32, i32
  }
  func.func @transform_3(%arg0: i32) -> (i32, i32) {
    %c0_i32 = arith.constant 0 : i32
    %c0_i32_0 = arith.constant 0 : i32
    %c0_i32_1 = arith.constant 0 : i32
    return %c0_i32, %c0_i32_0 : i32, i32
  }
  func.func @transform_4(%arg0: i32) -> (i32, i32) {
    %c0_i32 = arith.constant 0 : i32
    %c0_i32_0 = arith.constant 0 : i32
    %c0_i32_1 = arith.constant 0 : i32
    return %c0_i32, %c0_i32_0 : i32, i32
  }
  func.func @transform_5(%arg0: i32) -> (i32, i32) {
    %c0_i32 = arith.constant 0 : i32
    %c0_i32_0 = arith.constant 0 : i32
    return %arg0, %c0_i32 : i32, i32
  }
}

module attributes {stable_mosaic.version = 11 : i64} {
  func.func @simple_nn_kernel(%arg0: i32, %arg1: memref<512x16xf32, #tpu.memory_space<vmem>>, %arg2: memref<16x32xbf16, #tpu.memory_space<vmem>>, %arg3: memref<1x32xf32, #tpu.memory_space<vmem>>, %arg4: memref<32x8xbf16, #tpu.memory_space<vmem>>, %arg5: memref<1x8xf32, #tpu.memory_space<vmem>>, %arg6: memref<512x8xf32, #tpu.memory_space<vmem>>) attributes {dimension_semantics = [#tpu.dimension_semantics<parallel>], iteration_bounds = array<i64: 1>, scalar_prefetch = 0 : i64, scratch_operands = 0 : i64, tpu.core_type = #tpu.core_type<tc>, window_params = [{transform_indices = @transform_0, window_bounds = array<i64: 512, 16>}, {pipeline_mode = #tpu.pipeline_mode<synchronous>, transform_indices = @transform_1, window_bounds = array<i64: 16, 32>}, {pipeline_mode = #tpu.pipeline_mode<synchronous>, transform_indices = @transform_2, window_bounds = array<i64: 1, 32>}, {pipeline_mode = #tpu.pipeline_mode<synchronous>, transform_indices = @transform_3, window_bounds = array<i64: 32, 8>}, {pipeline_mode = #tpu.pipeline_mode<synchronous>, transform_indices = @transform_4, window_bounds = array<i64: 1, 8>}, {transform_indices = @transform_5, window_bounds = array<i64: 512, 8>}]} {
    %c0 = arith.constant 0 : index
    %c0_0 = arith.constant 0 : index
    %0 = vector.load %arg1[%c0, %c0_0] : memref<512x16xf32, #tpu.memory_space<vmem>>, vector<512x16xf32>
    %1 = arith.truncf %0 : vector<512x16xf32> to vector<512x16xbf16>
    %c0_1 = arith.constant 0 : index
    %c0_2 = arith.constant 0 : index
    %2 = vector.load %arg2[%c0_1, %c0_2] : memref<16x32xbf16, #tpu.memory_space<vmem>>, vector<16x32xbf16>
    %cst = arith.constant dense<0.000000e+00> : vector<512x32xf32>
    %3 = tpu.matmul %1, %2, %cst {dimension_numbers = #tpu.dot_dimension_numbers<[1], [0], [0], [1], [0, 0, 1, 1], [], []>} : vector<512x16xbf16>, vector<16x32xbf16>, vector<512x32xf32> -> vector<512x32xf32>
    %c0_3 = arith.constant 0 : index
    %c0_4 = arith.constant 0 : index
    %4 = vector.load %arg3[%c0_3, %c0_4] : memref<1x32xf32, #tpu.memory_space<vmem>>, vector<1x32xf32>
    %5 = vector.broadcast %4 : vector<1x32xf32> to vector<512x32xf32>
    %6 = arith.addf %3, %5 : vector<512x32xf32>
    %cst_5 = arith.constant 0.000000e+00 : f32
    %7 = vector.broadcast %cst_5 : f32 to vector<512x32xf32>
    %8 = arith.maximumf %6, %7 : vector<512x32xf32>
    %9 = arith.truncf %8 : vector<512x32xf32> to vector<512x32xbf16>
    %c0_6 = arith.constant 0 : index
    %c0_7 = arith.constant 0 : index
    %10 = vector.load %arg4[%c0_6, %c0_7] : memref<32x8xbf16, #tpu.memory_space<vmem>>, vector<32x8xbf16>
    %cst_8 = arith.constant dense<0.000000e+00> : vector<512x8xf32>
    %11 = tpu.matmul %9, %10, %cst_8 {dimension_numbers = #tpu.dot_dimension_numbers<[1], [0], [0], [1], [0, 0, 1, 1], [], []>} : vector<512x32xbf16>, vector<32x8xbf16>, vector<512x8xf32> -> vector<512x8xf32>
    %c0_9 = arith.constant 0 : index
    %c0_10 = arith.constant 0 : index
    %12 = vector.load %arg5[%c0_9, %c0_10] : memref<1x8xf32, #tpu.memory_space<vmem>>, vector<1x8xf32>
    %13 = vector.broadcast %12 : vector<1x8xf32> to vector<512x8xf32>
    %14 = arith.addf %11, %13 : vector<512x8xf32>
    %c0_11 = arith.constant 0 : index
    %c0_12 = arith.constant 0 : index
    %15 = vector.load %arg6[%c0_11, %c0_12] : memref<512x8xf32, #tpu.memory_space<vmem>>, vector<512x8xf32>
    tpu.vector_store %arg6[%c0_11, %c0_12], %14 {strides = array<i32>} : memref<512x8xf32, #tpu.memory_space<vmem>>, vector<512x8xf32>,
    return
  }
  func.func @transform_0(%arg0: i32) -> (i32, i32) {
    %c0_i32 = arith.constant 0 : i32
    %c0_i32_0 = arith.constant 0 : i32
    return %arg0, %c0_i32 : i32, i32
  }
  func.func @transform_1(%arg0: i32) -> (i32, i32) {
    %c0_i32 = arith.constant 0 : i32
    %c0_i32_0 = arith.constant 0 : i32
    %c0_i32_1 = arith.constant 0 : i32
    return %c0_i32, %c0_i32_0 : i32, i32
  }
  func.func @transform_2(%arg0: i32) -> (i32, i32) {
    %c0_i32 = arith.constant 0 : i32
    %c0_i32_0 = arith.constant 0 : i32
    %c0_i32_1 = arith.constant 0 : i32
    return %c0_i32, %c0_i32_0 : i32, i32
  }
  func.func @transform_3(%arg0: i32) -> (i32, i32) {
    %c0_i32 = arith.constant 0 : i32
    %c0_i32_0 = arith.constant 0 : i32
    %c0_i32_1 = arith.constant 0 : i32
    return %c0_i32, %c0_i32_0 : i32, i32
  }
  func.func @transform_4(%arg0: i32) -> (i32, i32) {
    %c0_i32 = arith.constant 0 : i32
    %c0_i32_0 = arith.constant 0 : i32
    %c0_i32_1 = arith.constant 0 : i32
    return %c0_i32, %c0_i32_0 : i32, i32
  }
  func.func @transform_5(%arg0: i32) -> (i32, i32) {
    %c0_i32 = arith.constant 0 : i32
    %c0_i32_0 = arith.constant 0 : i32
    return %arg0, %c0_i32 : i32, i32
  }
}

</mosaic_0001>

<bundles_post_ra>
// kernel: tpu_custom_call.1
= control target key start
LH: loop header
LB: loop body
LE: loop exit
PB: predicated region body
PF: predicated region fallthrough
CT: control target
= control target key end

     0   :  { %vm132_vm0 = vcmask 130048   ;;  %vm637_vm1 = vcmask 261120   ;;  %vm1023_vm2 = vcmask 64512   ;;  %s2054_s1 = inlined_call_operand.vmem [shape: bf16[16,32], index: 1, kind: input, shape index: {}]   ;;  %s2055_s0 = inlined_call_operand.vmem [shape: f32[512,16], index: 0, kind: input, shape index: {}]   ;;  %s2056_s3 = inlined_call_operand.vmem [shape: bf16[32,8], index: 3, kind: input, shape index: {}]   ;;  %s2057_s2 = inlined_call_operand.vmem [shape: f32[1,32], index: 2, kind: input, shape index: {}]   ;;  %s2058_s4 = inlined_call_operand.vmem [shape: f32[1,8], index: 4, kind: input, shape index: {}]   ;;  %s2059_s5 = inlined_call_operand.vmem [shape: f32[512,8], index: 5, kind: output, shape index: {}]  }
   0x1   :  { %v1362_v0 = vld [vmem:[%s2054_s1] sm:$0xff]   ;;  %v22_v2 = vld [vmem:[%s2055_s0 + $0x8] sm:$0xff]  ;;  %v23_v3 = vld [vmem:[%s2055_s0 + $0x10] sm:$0xff] }
   0x2   :  { %v21_v1 = vld [vmem:[%s2055_s0] sm:$0xff]  ;;  %1228 = vmatprep.subr.bf16.mxu0 %v1362_v0  ;;  %v24_v5 = vld [vmem:[%s2055_s0 + $0x18] sm:$0xff]  ;;  %v26_v7 = vld [vmem:[%s2055_s0 + $0x28] sm:$0xff] }
   0x3   :  { %v85_v4 = vpack.c.bf16 %v22_v2, %v21_v1  ;;  %v25_v6 = vld [vmem:[%s2055_s0 + $0x20] sm:$0xff]  ;;  %1229 = vmatpush3.bf16.msra.mxu0 %v1362_v0  ;;  %v86_v8 = vpack.c.bf16 %v24_v5, %v23_v3  ;;  %v27_v10 = vld [vmem:[%s2055_s0 + $0x30] sm:$0xff]  ;;  %v28_v11 = vld [vmem:[%s2055_s0 + $0x38] sm:$0xff] }
   0x4   :  { %v87_v9 = vpack.c.bf16 %v26_v7, %v25_v6  ;;  %v29_v12 = vld [vmem:[%s2055_s0 + $0x40] sm:$0xff]  ;;  %v30_v13 = vld [vmem:[%s2055_s0 + $0x48] sm:$0xff]  ;;  %v88_v14 = vpack.c.bf16 %v28_v11, %v27_v10  ;;  %v31_v16 = vld [vmem:[%s2055_s0 + $0x50] sm:$0xff] }
   0x5   :  { %1230 = vmatprep.mubr.msk.bf16.mxu0 %vm132_vm0, %v85_v4  ;;  %v89_v15 = vpack.c.bf16 %v30_v13, %v29_v12  ;;  %v32_v17 = vld [vmem:[%s2055_s0 + $0x58] sm:$0xff]  ;;  %v33_v18 = vld [vmem:[%s2055_s0 + $0x60] sm:$0xff]  ;;  %v34_v19 = vld [vmem:[%s2055_s0 + $0x68] sm:$0xff] }
   0x6   :  { %1231 = vmatmul.mubr.msk.bf16.vlgmr.msra.gmra.mxu0 %vm132_vm0, %v86_v8  ;;  %v90_v20 = vpack.c.bf16 %v32_v17, %v31_v16  ;;  %v91_v21 = vpack.c.bf16 %v34_v19, %v33_v18  ;;  %v35_v22 = vld [vmem:[%s2055_s0 + $0x70] sm:$0xff]  ;;  %v36_v23 = vld [vmem:[%s2055_s0 + $0x78] sm:$0xff]  ;;  %v37_v24 = vld [vmem:[%s2055_s0 + $0x80] sm:$0xff] }
   0x7   :  { %1234 = vmatprep.mubr.msk.bf16.mxu0 %vm132_vm0, %v87_v9  ;;  %v38_v25 = vld [vmem:[%s2055_s0 + $0x88] sm:$0xff]  ;;  %v92_v26 = vpack.c.bf16 %v36_v23, %v35_v22  ;;  %v39_v28 = vld [vmem:[%s2055_s0 + $0x90] sm:$0xff]  ;;  %v40_v29 = vld [vmem:[%s2055_s0 + $0x98] sm:$0xff] }
   0x8   :  { %v93_v27 = vpack.c.bf16 %v38_v25, %v37_v24  ;;  %v41_v30 = vld [vmem:[%s2055_s0 + $0xa0] sm:$0xff]  ;;  %v42_v31 = vld [vmem:[%s2055_s0 + $0xa8] sm:$0xff]  ;;  %v94_v32 = vpack.c.bf16 %v40_v29, %v39_v28  ;;  %v43_v34 = vld [vmem:[%s2055_s0 + $0xb0] sm:$0xff] }
   0x9   :  { %v95_v33 = vpack.c.bf16 %v42_v31, %v41_v30  ;;  %v44_v35 = vld [vmem:[%s2055_s0 + $0xb8] sm:$0xff]  ;;  %v45_v36 = vld [vmem:[%s2055_s0 + $0xc0] sm:$0xff]  ;;  %v46_v37 = vld [vmem:[%s2055_s0 + $0xc8] sm:$0xff] }
   0xa   :  { %v96_v38 = vpack.c.bf16 %v44_v35, %v43_v34  ;;  %v97_v39 = vpack.c.bf16 %v46_v37, %v45_v36  ;;  %v47_v40 = vld [vmem:[%s2055_s0 + $0xd0] sm:$0xff]  ;;  %v48_v41 = vld [vmem:[%s2055_s0 + $0xd8] sm:$0xff]  ;;  %v49_v42 = vld [vmem:[%s2055_s0 + $0xe0] sm:$0xff] }
   0xb   :  { %v50_v43 = vld [vmem:[%s2055_s0 + $0xe8] sm:$0xff]  ;;  %v98_v44 = vpack.c.bf16 %v48_v41, %v47_v40  ;;  %v51_v46 = vld [vmem:[%s2055_s0 + $0xf0] sm:$0xff]  ;;  %v52_v47 = vld [vmem:[%s2055_s0 + $0xf8] sm:$0xff] }
   0xc   :  { %v99_v45 = vpack.c.bf16 %v50_v43, %v49_v42  ;;  %v53_v48 = vld [vmem:[%s2055_s0 + $0x100] sm:$0xff]  ;;  %v54_v49 = vld [vmem:[%s2055_s0 + $0x108] sm:$0xff]  ;;  %v100_v50 = vpack.c.bf16 %v52_v47, %v51_v46  ;;  %v55_v52 = vld [vmem:[%s2055_s0 + $0x110] sm:$0xff] }
   0xd   :  { %v101_v51 = vpack.c.bf16 %v54_v49, %v53_v48  ;;  %v56_v53 = vld [vmem:[%s2055_s0 + $0x118] sm:$0xff]  ;;  %v57_v54 = vld [vmem:[%s2055_s0 + $0x120] sm:$0xff]  ;;  %v58_v55 = vld [vmem:[%s2055_s0 + $0x128] sm:$0xff] }
   0xe   :  { %1235 = vmatmul.mubr.msk.bf16.gmra.mxu0 %vm132_vm0, %v88_v14  ;;  %v102_v56 = vpack.c.bf16 %v56_v53, %v55_v52  ;;  %v103_v57 = vpack.c.bf16 %v58_v55, %v57_v54  ;;  %v59_v58 = vld [vmem:[%s2055_s0 + $0x130] sm:$0xff]  ;;  %v60_v59 = vld [vmem:[%s2055_s0 + $0x138] sm:$0xff]  ;;  %v61_v60 = vld [vmem:[%s2055_s0 + $0x140] sm:$0xff] }
   0xf   :  { %1238 = vmatprep.mubr.msk.bf16.mxu0 %vm132_vm0, %v89_v15  ;;  %v62_v61 = vld [vmem:[%s2055_s0 + $0x148] sm:$0xff]  ;;  %v104_v62 = vpack.c.bf16 %v60_v59, %v59_v58  ;;  %v1364_v1 = vld [vmem:[%s2056_s3] sm:$0xff]   ;;  %v63_v2 = vld [vmem:[%s2055_s0 + $0x150] sm:$0xff] }
  0x10   :  { %v1363_v63 = vld [vmem:[%s2056_s3 + $0x8] sm:$0xff]   ;;  %v105_v0 = vpack.c.bf16 %v62_v61, %v61_v60  ;;  %v64_v3 = vld [vmem:[%s2055_s0 + $0x158] sm:$0xff]  ;;  %v65_v4 = vld [vmem:[%s2055_s0 + $0x160] sm:$0xff] }
  0x11   :  { %1294 = vmatprep.subr.bf16.mxu1 %v1363_v63  ;;  %v66_v5 = vld [vmem:[%s2055_s0 + $0x168] sm:$0xff]  ;;  %v106_v6 = vpack.c.bf16 %v64_v3, %v63_v2  ;;  %v67_v8 = vld [vmem:[%s2055_s0 + $0x170] sm:$0xff]  ;;  %v68_v9 = vld [vmem:[%s2055_s0 + $0x178] sm:$0xff] }
  0x12   :  { %1295 = vmatpush3.bf16.msra.mxu1 %v1363_v63  ;;  %v107_v7 = vpack.c.bf16 %v66_v5, %v65_v4  ;;  %v69_v10 = vld [vmem:[%s2055_s0 + $0x180] sm:$0xff]  ;;  %v70_v11 = vld [vmem:[%s2055_s0 + $0x188] sm:$0xff]  ;;  %v108_v12 = vpack.c.bf16 %v68_v9, %v67_v8  ;;  %v71_v14 = vld [vmem:[%s2055_s0 + $0x190] sm:$0xff] }
  0x13   :  { %1296 = vmatprep.subr.bf16.mxu1 %v1364_v1  ;;  %v109_v13 = vpack.c.bf16 %v70_v11, %v69_v10  ;;  %v72_v15 = vld [vmem:[%s2055_s0 + $0x198] sm:$0xff]  ;;  %v73_v16 = vld [vmem:[%s2055_s0 + $0x1a0] sm:$0xff]  ;;  %v74_v17 = vld [vmem:[%s2055_s0 + $0x1a8] sm:$0xff] }
  0x14   :  { %v110_v18 = vpack.c.bf16 %v72_v15, %v71_v14  ;;  %v111_v19 = vpack.c.bf16 %v74_v17, %v73_v16  ;;  %v77_v22 = vld [vmem:[%s2055_s0 + $0x1c0] sm:$0xff]  ;;  %v78_v23 = vld [vmem:[%s2055_s0 + $0x1c8] sm:$0xff] }
  0x15   :  { %v113_v25 = vpack.c.bf16 %v78_v23, %v77_v22  ;;  %v81_v28 = vld [vmem:[%s2055_s0 + $0x1e0] sm:$0xff]  ;;  %v82_v29 = vld [vmem:[%s2055_s0 + $0x1e8] sm:$0xff] }
  0x16   :  { %1239 = vmatmul.mubr.msk.bf16.gmra.mxu0 %vm132_vm0, %v90_v20  ;;  %1297 = vmatpush3.bf16.msra.mxu1 %v1364_v1  ;;  %v75_v20 = vld [vmem:[%s2055_s0 + $0x1b0] sm:$0xff]  ;;  %v115_v31 = vpack.c.bf16 %v82_v29, %v81_v28  ;;  %v1631_v37 = vld [vmem:[%s2057_s2] ss:$0 sm:$0xff] }
  0x17   :  { %1242 = vmatprep.mubr.msk.bf16.mxu0 %vm132_vm0, %v91_v21  ;;  %v76_v21 = vld [vmem:[%s2055_s0 + $0x1b8] sm:$0xff] }
  0x18   :  { %v112_v24 = vpack.c.bf16 %v76_v21, %v75_v20 }
  0x1e   :  { %1243 = vmatmul.mubr.msk.bf16.gmra.mxu0 %vm132_vm0, %v92_v26  ;;  %v79_v26 = vld [vmem:[%s2055_s0 + $0x1d0] sm:$0xff] }
  0x1f   :  { %1246 = vmatprep.mubr.msk.bf16.mxu0 %vm132_vm0, %v93_v27  ;;  %v80_v27 = vld [vmem:[%s2055_s0 + $0x1d8] sm:$0xff] }
  0x20   :  { %v114_v30 = vpack.c.bf16 %v80_v27, %v79_v26 }
  0x26   :  { %1247 = vmatmul.mubr.msk.bf16.gmra.mxu0 %vm132_vm0, %v94_v32  ;;  %v83_v32 = vld [vmem:[%s2055_s0 + $0x1f0] sm:$0xff] }
  0x27   :  { %1250 = vmatprep.mubr.msk.bf16.mxu0 %vm132_vm0, %v95_v33  ;;  %v84_v33 = vld [vmem:[%s2055_s0 + $0x1f8] sm:$0xff] }
  0x28   :  { %v116_v34 = vpack.c.bf16 %v84_v33, %v83_v32 }
  0x2e   :  { %1251 = vmatmul.mubr.msk.bf16.gmra.mxu0 %vm132_vm0, %v96_v38 }
  0x2f   :  { %1254 = vmatprep.mubr.msk.bf16.mxu0 %vm132_vm0, %v97_v39 }
  0x36   :  { %1255 = vmatmul.mubr.msk.bf16.gmra.mxu0 %vm132_vm0, %v98_v44 }
  0x37   :  { %1258 = vmatprep.mubr.msk.bf16.mxu0 %vm132_vm0, %v99_v45 }
  0x3e   :  { %1259 = vmatmul.mubr.msk.bf16.gmra.mxu0 %vm132_vm0, %v100_v50 }
  0x3f   :  { %1262 = vmatprep.mubr.msk.bf16.mxu0 %vm132_vm0, %v101_v51 }
  0x46   :  { %1263 = vmatmul.mubr.msk.bf16.gmra.mxu0 %vm132_vm0, %v102_v56 }
  0x47   :  { %1266 = vmatprep.mubr.msk.bf16.mxu0 %vm132_vm0, %v103_v57 }
  0x4e   :  { %1267 = vmatmul.mubr.msk.bf16.gmra.mxu0 %vm132_vm0, %v104_v62 }
  0x4f   :  { %1270 = vmatprep.mubr.msk.bf16.mxu0 %vm132_vm0, %v105_v0 }
  0x56   :  { %1271 = vmatmul.mubr.msk.bf16.gmra.mxu0 %vm132_vm0, %v106_v6 }
  0x57   :  { %1274 = vmatprep.mubr.msk.bf16.mxu0 %vm132_vm0, %v107_v7 }
  0x5e   :  { %1275 = vmatmul.mubr.msk.bf16.gmra.mxu0 %vm132_vm0, %v108_v12 }
  0x5f   :  { %1278 = vmatprep.mubr.msk.bf16.mxu0 %vm132_vm0, %v109_v13 }
  0x66   :  { %1279 = vmatmul.mubr.msk.bf16.gmra.mxu0 %vm132_vm0, %v110_v18 }
  0x67   :  { %1282 = vmatprep.mubr.msk.bf16.mxu0 %vm132_vm0, %v111_v19 }
  0x6e   :  { %1283 = vmatmul.mubr.msk.bf16.gmra.mxu0 %vm132_vm0, %v112_v24 }
  0x6f   :  { %1286 = vmatprep.mubr.msk.bf16.mxu0 %vm132_vm0, %v113_v25 }
  0x76   :  { %1287 = vmatmul.mubr.msk.bf16.gmra.mxu0 %vm132_vm0, %v114_v30 }
  0x77   :  { %1290 = vmatprep.mubr.msk.bf16.mxu0 %vm132_vm0, %v115_v31 }
  0x7e   :  { %1291 = vmatmul.mubr.msk.bf16.gmra.mxu0 %vm132_vm0, %v116_v34 }
  0xc6   :  { %v1232_v35 = vpop.f32.mrf.mxu0 }
  0xc7   :  { %v272_v41 = vadd.f32 %v1232_v35, %v1631_v37 }
  0xc8   :  { %v263_v36 = vpop.f32.mrf.mxu0 }
  0xc9   :  { %v264_v39 = vadd.f32 %v1631_v37, %v263_v36  ;;  %v520_v48 = vmax.f32 %v272_v41, 0.0 }
  0xca   :  { %v1233_v38 = vpop.f32.mrf.mxu0 }
  0xcb   :  { %v275_v40 = vadd.f32 %v1233_v38, %v1631_v37  ;;  %v518_v46 = vmax.f32 %v264_v39, 0.0 }
  0xcc   :  { %v266_v42 = vpop.f32.mrf.mxu0 }
  0xcd   :  { %v267_v43 = vadd.f32 %v1631_v37, %v266_v42  ;;  %v521_v44 = vmax.f32 %v275_v40, 0.0 }
  0xce   :  { %v1236_v45 = vpop.f32.mrf.mxu0 }
  0xcf   :  { %v519_v47 = vmax.f32 %v267_v43, 0.0  ;;  %v583_v51 = vpack.c.bf16 %v521_v44, %v520_v48  ;;  %v288_v55 = vadd.f32 %v1236_v45, %v1631_v37 }
  0xd0   :  { %v279_v49 = vpop.f32.mrf.mxu0 }
  0xd1   :  { %v582_v50 = vpack.c.bf16 %v519_v47, %v518_v46  ;;  %v280_v53 = vadd.f32 %v1631_v37, %v279_v49  ;;  %v524_v62 = vmax.f32 %v288_v55, 0.0 }
  0xd2   :  { %v1237_v52 = vpop.f32.mrf.mxu0 }
  0xd3   :  { %v291_v54 = vadd.f32 %v1237_v52, %v1631_v37  ;;  %1298 = vmatprep.mubr.msk.bf16.mxu1 %vm637_vm1, %v582_v50  ;;  %v522_v60 = vmax.f32 %v280_v53, 0.0 }
  0xd4   :  { %v282_v56 = vpop.f32.mrf.mxu0  ;;  %1299 = vmatmul.mubr.msk.bf16.vlgmr.msra.gmra.mxu1 %vm637_vm1, %v583_v51 }
  0xd5   :  { %v283_v57 = vadd.f32 %v1631_v37, %v282_v56  ;;  %v525_v58 = vmax.f32 %v291_v54, 0.0 }
  0xd6   :  { %v1240_v59 = vpop.f32.mrf.mxu0 }
  0xd7   :  { %v523_v61 = vmax.f32 %v283_v57, 0.0  ;;  %v585_v1 = vpack.c.bf16 %v525_v58, %v524_v62  ;;  %v304_v5 = vadd.f32 %v1240_v59, %v1631_v37 }
  0xd8   :  { %v295_v63 = vpop.f32.mrf.mxu0 }
  0xd9   :  { %v584_v0 = vpack.c.bf16 %v523_v61, %v522_v60  ;;  %v296_v3 = vadd.f32 %v1631_v37, %v295_v63  ;;  %v528_v12 = vmax.f32 %v304_v5, 0.0 }
  0xda   :  { %v1241_v2 = vpop.f32.mrf.mxu0 }
  0xdb   :  { %v307_v4 = vadd.f32 %v1241_v2, %v1631_v37  ;;  %1302 = vmatprep.mubr.msk.bf16.mxu1 %vm637_vm1, %v584_v0  ;;  %v526_v10 = vmax.f32 %v296_v3, 0.0 }
  0xdc   :  { %v298_v6 = vpop.f32.mrf.mxu0  ;;  %1303 = vmatmul.mubr.msk.bf16.gmra.mxu1 %vm637_vm1, %v585_v1 }
  0xdd   :  { %v299_v7 = vadd.f32 %v1631_v37, %v298_v6  ;;  %v529_v8 = vmax.f32 %v307_v4, 0.0 }
  0xde   :  { %v1244_v9 = vpop.f32.mrf.mxu0 }
  0xdf   :  { %v527_v11 = vmax.f32 %v299_v7, 0.0  ;;  %v587_v15 = vpack.c.bf16 %v529_v8, %v528_v12  ;;  %v320_v19 = vadd.f32 %v1244_v9, %v1631_v37 }
  0xe0   :  { %v311_v13 = vpop.f32.mrf.mxu0 }
  0xe1   :  { %v586_v14 = vpack.c.bf16 %v527_v11, %v526_v10  ;;  %v312_v17 = vadd.f32 %v1631_v37, %v311_v13  ;;  %v532_v26 = vmax.f32 %v320_v19, 0.0 }
  0xe2   :  { %v1245_v16 = vpop.f32.mrf.mxu0 }
  0xe3   :  { %v323_v18 = vadd.f32 %v1245_v16, %v1631_v37  ;;  %1306 = vmatprep.mubr.msk.bf16.mxu1 %vm637_vm1, %v586_v14  ;;  %v530_v24 = vmax.f32 %v312_v17, 0.0 }
  0xe4   :  { %v314_v20 = vpop.f32.mrf.mxu0  ;;  %1307 = vmatmul.mubr.msk.bf16.gmra.mxu1 %vm637_vm1, %v587_v15 }
  0xe5   :  { %v315_v21 = vadd.f32 %v1631_v37, %v314_v20  ;;  %v533_v22 = vmax.f32 %v323_v18, 0.0 }
  0xe6   :  { %v1248_v23 = vpop.f32.mrf.mxu0 }
  0xe7   :  { %v531_v25 = vmax.f32 %v315_v21, 0.0  ;;  %v589_v29 = vpack.c.bf16 %v533_v22, %v532_v26  ;;  %v336_v33 = vadd.f32 %v1248_v23, %v1631_v37 }
  0xe8   :  { %v327_v27 = vpop.f32.mrf.mxu0 }
  0xe9   :  { %v588_v28 = vpack.c.bf16 %v531_v25, %v530_v24  ;;  %v328_v31 = vadd.f32 %v1631_v37, %v327_v27  ;;  %v536_v41 = vmax.f32 %v336_v33, 0.0 }
  0xea   :  { %v1249_v30 = vpop.f32.mrf.mxu0 }
  0xeb   :  { %v339_v32 = vadd.f32 %v1249_v30, %v1631_v37  ;;  %1310 = vmatprep.mubr.msk.bf16.mxu1 %vm637_vm1, %v588_v28  ;;  %v534_v39 = vmax.f32 %v328_v31, 0.0 }
  0xec   :  { %v330_v34 = vpop.f32.mrf.mxu0  ;;  %1311 = vmatmul.mubr.msk.bf16.gmra.mxu1 %vm637_vm1, %v589_v29 }
  0xed   :  { %v331_v35 = vadd.f32 %v1631_v37, %v330_v34  ;;  %v537_v36 = vmax.f32 %v339_v32, 0.0 }
  0xee   :  { %v1252_v38 = vpop.f32.mrf.mxu0 }
  0xef   :  { %v535_v40 = vmax.f32 %v331_v35, 0.0  ;;  %v591_v44 = vpack.c.bf16 %v537_v36, %v536_v41  ;;  %v352_v48 = vadd.f32 %v1252_v38, %v1631_v37 }
  0xf0   :  { %v343_v42 = vpop.f32.mrf.mxu0 }
  0xf1   :  { %v590_v43 = vpack.c.bf16 %v535_v40, %v534_v39  ;;  %v344_v46 = vadd.f32 %v1631_v37, %v343_v42  ;;  %v540_v55 = vmax.f32 %v352_v48, 0.0 }
  0xf2   :  { %v1253_v45 = vpop.f32.mrf.mxu0 }
  0xf3   :  { %v355_v47 = vadd.f32 %v1253_v45, %v1631_v37  ;;  %1314 = vmatprep.mubr.msk.bf16.mxu1 %vm637_vm1, %v590_v43  ;;  %v538_v53 = vmax.f32 %v344_v46, 0.0 }
  0xf4   :  { %v346_v49 = vpop.f32.mrf.mxu0  ;;  %1315 = vmatmul.mubr.msk.bf16.gmra.mxu1 %vm637_vm1, %v591_v44 }
  0xf5   :  { %v347_v50 = vadd.f32 %v1631_v37, %v346_v49  ;;  %v541_v51 = vmax.f32 %v355_v47, 0.0 }
  0xf6   :  { %v1256_v52 = vpop.f32.mrf.mxu0 }
  0xf7   :  { %v539_v54 = vmax.f32 %v347_v50, 0.0  ;;  %v593_v58 = vpack.c.bf16 %v541_v51, %v540_v55  ;;  %v368_v62 = vadd.f32 %v1256_v52, %v1631_v37 }
  0xf8   :  { %v359_v56 = vpop.f32.mrf.mxu0 }
  0xf9   :  { %v592_v57 = vpack.c.bf16 %v539_v54, %v538_v53  ;;  %v360_v60 = vadd.f32 %v1631_v37, %v359_v56  ;;  %v544_v5 = vmax.f32 %v368_v62, 0.0 }
  0xfa   :  { %v1257_v59 = vpop.f32.mrf.mxu0 }
  0xfb   :  { %v371_v61 = vadd.f32 %v1257_v59, %v1631_v37  ;;  %1318 = vmatprep.mubr.msk.bf16.mxu1 %vm637_vm1, %v592_v57  ;;  %v542_v3 = vmax.f32 %v360_v60, 0.0 }
  0xfc   :  { %v362_v63 = vpop.f32.mrf.mxu0  ;;  %1319 = vmatmul.mubr.msk.bf16.gmra.mxu1 %vm637_vm1, %v593_v58 }
  0xfd   :  { %v363_v0 = vadd.f32 %v1631_v37, %v362_v63  ;;  %v545_v1 = vmax.f32 %v371_v61, 0.0 }
  0xfe   :  { %v1260_v2 = vpop.f32.mrf.mxu0 }
  0xff   :  { %v543_v4 = vmax.f32 %v363_v0, 0.0  ;;  %v595_v8 = vpack.c.bf16 %v545_v1, %v544_v5  ;;  %v384_v12 = vadd.f32 %v1260_v2, %v1631_v37 }
 0x100   :  { %v375_v6 = vpop.f32.mrf.mxu0 }
 0x101   :  { %v594_v7 = vpack.c.bf16 %v543_v4, %v542_v3  ;;  %v376_v10 = vadd.f32 %v1631_v37, %v375_v6  ;;  %v548_v19 = vmax.f32 %v384_v12, 0.0 }
 0x102   :  { %v1261_v9 = vpop.f32.mrf.mxu0 }
 0x103   :  { %v387_v11 = vadd.f32 %v1261_v9, %v1631_v37  ;;  %1322 = vmatprep.mubr.msk.bf16.mxu1 %vm637_vm1, %v594_v7  ;;  %v546_v17 = vmax.f32 %v376_v10, 0.0 }
 0x104   :  { %v378_v13 = vpop.f32.mrf.mxu0  ;;  %1323 = vmatmul.mubr.msk.bf16.gmra.mxu1 %vm637_vm1, %v595_v8 }
 0x105   :  { %v379_v14 = vadd.f32 %v1631_v37, %v378_v13  ;;  %v549_v15 = vmax.f32 %v387_v11, 0.0 }
 0x106   :  { %v1264_v16 = vpop.f32.mrf.mxu0 }
 0x107   :  { %v547_v18 = vmax.f32 %v379_v14, 0.0  ;;  %v597_v22 = vpack.c.bf16 %v549_v15, %v548_v19  ;;  %v400_v26 = vadd.f32 %v1264_v16, %v1631_v37 }
 0x108   :  { %v391_v20 = vpop.f32.mrf.mxu0 }
 0x109   :  { %v596_v21 = vpack.c.bf16 %v547_v18, %v546_v17  ;;  %v392_v24 = vadd.f32 %v1631_v37, %v391_v20  ;;  %v552_v33 = vmax.f32 %v400_v26, 0.0 }
 0x10a   :  { %v1265_v23 = vpop.f32.mrf.mxu0 }
 0x10b   :  { %v403_v25 = vadd.f32 %v1265_v23, %v1631_v37  ;;  %1326 = vmatprep.mubr.msk.bf16.mxu1 %vm637_vm1, %v596_v21  ;;  %v550_v31 = vmax.f32 %v392_v24, 0.0 }
 0x10c   :  { %v394_v27 = vpop.f32.mrf.mxu0  ;;  %1327 = vmatmul.mubr.msk.bf16.gmra.mxu1 %vm637_vm1, %v597_v22 }
 0x10d   :  { %v395_v28 = vadd.f32 %v1631_v37, %v394_v27  ;;  %v553_v29 = vmax.f32 %v403_v25, 0.0 }
 0x10e   :  { %v1268_v30 = vpop.f32.mrf.mxu0 }
 0x10f   :  { %v551_v32 = vmax.f32 %v395_v28, 0.0  ;;  %v599_v36 = vpack.c.bf16 %v553_v29, %v552_v33  ;;  %v416_v41 = vadd.f32 %v1268_v30, %v1631_v37 }
 0x110   :  { %v407_v34 = vpop.f32.mrf.mxu0 }
 0x111   :  { %v598_v35 = vpack.c.bf16 %v551_v32, %v550_v31  ;;  %v408_v39 = vadd.f32 %v1631_v37, %v407_v34  ;;  %v556_v48 = vmax.f32 %v416_v41, 0.0 }
 0x112   :  { %v1269_v38 = vpop.f32.mrf.mxu0 }
 0x113   :  { %v419_v40 = vadd.f32 %v1269_v38, %v1631_v37  ;;  %1330 = vmatprep.mubr.msk.bf16.mxu1 %vm637_vm1, %v598_v35  ;;  %v554_v46 = vmax.f32 %v408_v39, 0.0 }
 0x114   :  { %v410_v42 = vpop.f32.mrf.mxu0  ;;  %1331 = vmatmul.mubr.msk.bf16.gmra.mxu1 %vm637_vm1, %v599_v36 }
 0x115   :  { %v411_v43 = vadd.f32 %v1631_v37, %v410_v42  ;;  %v557_v44 = vmax.f32 %v419_v40, 0.0 }
 0x116   :  { %v1272_v45 = vpop.f32.mrf.mxu0 }
 0x117   :  { %v555_v47 = vmax.f32 %v411_v43, 0.0  ;;  %v601_v51 = vpack.c.bf16 %v557_v44, %v556_v48  ;;  %v432_v55 = vadd.f32 %v1272_v45, %v1631_v37 }
 0x118   :  { %v423_v49 = vpop.f32.mrf.mxu0 }
 0x119   :  { %v600_v50 = vpack.c.bf16 %v555_v47, %v554_v46  ;;  %v424_v53 = vadd.f32 %v1631_v37, %v423_v49  ;;  %v560_v62 = vmax.f32 %v432_v55, 0.0 }
 0x11a   :  { %v1273_v52 = vpop.f32.mrf.mxu0 }
 0x11b   :  { %v435_v54 = vadd.f32 %v1273_v52, %v1631_v37  ;;  %1334 = vmatprep.mubr.msk.bf16.mxu1 %vm637_vm1, %v600_v50  ;;  %v558_v60 = vmax.f32 %v424_v53, 0.0 }
 0x11c   :  { %v426_v56 = vpop.f32.mrf.mxu0  ;;  %1335 = vmatmul.mubr.msk.bf16.gmra.mxu1 %vm637_vm1, %v601_v51 }
 0x11d   :  { %v427_v57 = vadd.f32 %v1631_v37, %v426_v56  ;;  %v561_v58 = vmax.f32 %v435_v54, 0.0 }
 0x11e   :  { %v1276_v59 = vpop.f32.mrf.mxu0 }
 0x11f   :  { %v559_v61 = vmax.f32 %v427_v57, 0.0  ;;  %v603_v1 = vpack.c.bf16 %v561_v58, %v560_v62  ;;  %v448_v5 = vadd.f32 %v1276_v59, %v1631_v37 }
 0x120   :  { %v439_v63 = vpop.f32.mrf.mxu0 }
 0x121   :  { %v602_v0 = vpack.c.bf16 %v559_v61, %v558_v60  ;;  %v440_v3 = vadd.f32 %v1631_v37, %v439_v63  ;;  %v564_v12 = vmax.f32 %v448_v5, 0.0 }
 0x122   :  { %v1277_v2 = vpop.f32.mrf.mxu0 }
 0x123   :  { %v451_v4 = vadd.f32 %v1277_v2, %v1631_v37  ;;  %1338 = vmatprep.mubr.msk.bf16.mxu1 %vm637_vm1, %v602_v0  ;;  %v562_v10 = vmax.f32 %v440_v3, 0.0 }
 0x124   :  { %v442_v6 = vpop.f32.mrf.mxu0  ;;  %1339 = vmatmul.mubr.msk.bf16.gmra.mxu1 %vm637_vm1, %v603_v1 }
 0x125   :  { %v443_v7 = vadd.f32 %v1631_v37, %v442_v6  ;;  %v565_v8 = vmax.f32 %v451_v4, 0.0 }
 0x126   :  { %v1280_v9 = vpop.f32.mrf.mxu0 }
 0x127   :  { %v563_v11 = vmax.f32 %v443_v7, 0.0  ;;  %v605_v15 = vpack.c.bf16 %v565_v8, %v564_v12  ;;  %v464_v19 = vadd.f32 %v1280_v9, %v1631_v37  ;;  %v1732_v7 = vld [vmem:[%s2058_s4] ss:$0 sm:$0xff] }
 0x128   :  { %v455_v13 = vpop.f32.mrf.mxu0 }
 0x129   :  { %v604_v14 = vpack.c.bf16 %v563_v11, %v562_v10  ;;  %v456_v17 = vadd.f32 %v1631_v37, %v455_v13  ;;  %v568_v26 = vmax.f32 %v464_v19, 0.0 }
 0x12a   :  { %v1281_v16 = vpop.f32.mrf.mxu0 }
 0x12b   :  { %v467_v18 = vadd.f32 %v1281_v16, %v1631_v37  ;;  %1342 = vmatprep.mubr.msk.bf16.mxu1 %vm637_vm1, %v604_v14  ;;  %v566_v24 = vmax.f32 %v456_v17, 0.0 }
 0x12c   :  { %v458_v20 = vpop.f32.mrf.mxu0  ;;  %1343 = vmatmul.mubr.msk.bf16.gmra.mxu1 %vm637_vm1, %v605_v15 }
 0x12d   :  { %v459_v21 = vadd.f32 %v1631_v37, %v458_v20  ;;  %v569_v22 = vmax.f32 %v467_v18, 0.0 }
 0x12e   :  { %v1284_v23 = vpop.f32.mrf.mxu0 }
 0x12f   :  { %v567_v25 = vmax.f32 %v459_v21, 0.0  ;;  %v607_v29 = vpack.c.bf16 %v569_v22, %v568_v26  ;;  %v480_v33 = vadd.f32 %v1284_v23, %v1631_v37 }
 0x130   :  { %v471_v27 = vpop.f32.mrf.mxu0 }
 0x131   :  { %v606_v28 = vpack.c.bf16 %v567_v25, %v566_v24  ;;  %v472_v31 = vadd.f32 %v1631_v37, %v471_v27  ;;  %v572_v41 = vmax.f32 %v480_v33, 0.0 }
 0x132   :  { %v1285_v30 = vpop.f32.mrf.mxu0 }
 0x133   :  { %v483_v32 = vadd.f32 %v1285_v30, %v1631_v37  ;;  %1346 = vmatprep.mubr.msk.bf16.mxu1 %vm637_vm1, %v606_v28  ;;  %v570_v39 = vmax.f32 %v472_v31, 0.0 }
 0x134   :  { %v474_v34 = vpop.f32.mrf.mxu0  ;;  %1347 = vmatmul.mubr.msk.bf16.gmra.mxu1 %vm637_vm1, %v607_v29 }
 0x135   :  { %v475_v35 = vadd.f32 %v1631_v37, %v474_v34  ;;  %v573_v36 = vmax.f32 %v483_v32, 0.0 }
 0x136   :  { %v1288_v38 = vpop.f32.mrf.mxu0 }
 0x137   :  { %v571_v40 = vmax.f32 %v475_v35, 0.0  ;;  %v609_v44 = vpack.c.bf16 %v573_v36, %v572_v41  ;;  %v496_v48 = vadd.f32 %v1288_v38, %v1631_v37 }
 0x138   :  { %v487_v42 = vpop.f32.mrf.mxu0 }
 0x139   :  { %v608_v43 = vpack.c.bf16 %v571_v40, %v570_v39  ;;  %v488_v46 = vadd.f32 %v1631_v37, %v487_v42  ;;  %v576_v55 = vmax.f32 %v496_v48, 0.0 }
 0x13a   :  { %v1289_v45 = vpop.f32.mrf.mxu0 }
 0x13b   :  { %v499_v47 = vadd.f32 %v1289_v45, %v1631_v37  ;;  %1350 = vmatprep.mubr.msk.bf16.mxu1 %vm637_vm1, %v608_v43  ;;  %v574_v53 = vmax.f32 %v488_v46, 0.0 }
 0x13c   :  { %v490_v49 = vpop.f32.mrf.mxu0  ;;  %1351 = vmatmul.mubr.msk.bf16.gmra.mxu1 %vm637_vm1, %v609_v44 }
 0x13d   :  { %v491_v50 = vadd.f32 %v1631_v37, %v490_v49  ;;  %v577_v51 = vmax.f32 %v499_v47, 0.0 }
 0x13e   :  { %v1292_v52 = vpop.f32.mrf.mxu0 }
 0x13f   :  { %v575_v54 = vmax.f32 %v491_v50, 0.0  ;;  %v611_v58 = vpack.c.bf16 %v577_v51, %v576_v55  ;;  %v512_v62 = vadd.f32 %v1292_v52, %v1631_v37 }
 0x140   :  { %v503_v56 = vpop.f32.mrf.mxu0 }
 0x141   :  { %v610_v57 = vpack.c.bf16 %v575_v54, %v574_v53  ;;  %v504_v60 = vadd.f32 %v1631_v37, %v503_v56  ;;  %v580_v4 = vmax.f32 %v512_v62, 0.0 }
 0x142   :  { %v1293_v59 = vpop.f32.mrf.mxu0 }
 0x143   :  { %v515_v61 = vadd.f32 %v1293_v59, %v1631_v37  ;;  %1354 = vmatprep.mubr.msk.bf16.mxu1 %vm637_vm1, %v610_v57  ;;  %v578_v2 = vmax.f32 %v504_v60, 0.0 }
 0x144   :  { %v506_v63 = vpop.f32.mrf.mxu0  ;;  %1355 = vmatmul.mubr.msk.bf16.gmra.mxu1 %vm637_vm1, %v611_v58 }
 0x145   :  { %v507_v0 = vadd.f32 %v1631_v37, %v506_v63  ;;  %v581_v1 = vmax.f32 %v515_v61, 0.0 }
 0x147   :  { %v579_v3 = vmax.f32 %v507_v0, 0.0  ;;  %v613_v6 = vpack.c.bf16 %v581_v1, %v580_v4 }
 0x149   :  { %v612_v5 = vpack.c.bf16 %v579_v3, %v578_v2 }
 0x14b   :  { %1358 = vmatprep.mubr.msk.bf16.mxu1 %vm637_vm1, %v612_v5 }
 0x14c   :  { %1359 = vmatmul.mubr.msk.bf16.gmra.mxu1 %vm637_vm1, %v613_v6 }
 0x194   :  { %v1300_v8 = vpop.f32.mrf.mxu1 }
 0x195   :  { %v777_v9 = vadd.f32 %v1300_v8, %v1732_v7 }
 0x196   :  { %v768_v37 = vpop.f32.mrf.mxu1 }
 0x197   :  { %1026 = vst.msk [vmem:[%s2059_s5 + $0x10] sm:$0xff] %vm1023_vm2, %v777_v9  ;;  %v769_v10 = vadd.f32 %v1732_v7, %v768_v37 }
 0x198   :  { %v1301_v11 = vpop.f32.mrf.mxu1 }
 0x199   :  { %1024 = vst.msk [vmem:[%s2059_s5] sm:$0xff] %vm1023_vm2, %v769_v10  ;;  %v780_v12 = vadd.f32 %v1301_v11, %v1732_v7 }
 0x19a   :  { %v771_v13 = vpop.f32.mrf.mxu1 }
 0x19b   :  { %1027 = vst.msk [vmem:[%s2059_s5 + $0x18] sm:$0xff] %vm1023_vm2, %v780_v12  ;;  %v772_v14 = vadd.f32 %v1732_v7, %v771_v13 }
 0x19c   :  { %v1304_v15 = vpop.f32.mrf.mxu1 }
 0x19d   :  { %1025 = vst.msk [vmem:[%s2059_s5 + $0x8] sm:$0xff] %vm1023_vm2, %v772_v14  ;;  %v793_v16 = vadd.f32 %v1304_v15, %v1732_v7 }
 0x19e   :  { %v784_v17 = vpop.f32.mrf.mxu1 }
 0x19f   :  { %1030 = vst.msk [vmem:[%s2059_s5 + $0x30] sm:$0xff] %vm1023_vm2, %v793_v16  ;;  %v785_v18 = vadd.f32 %v1732_v7, %v784_v17 }
 0x1a0   :  { %v1305_v19 = vpop.f32.mrf.mxu1 }
 0x1a1   :  { %1028 = vst.msk [vmem:[%s2059_s5 + $0x20] sm:$0xff] %vm1023_vm2, %v785_v18  ;;  %v796_v20 = vadd.f32 %v1305_v19, %v1732_v7 }
 0x1a2   :  { %v787_v21 = vpop.f32.mrf.mxu1 }
 0x1a3   :  { %1031 = vst.msk [vmem:[%s2059_s5 + $0x38] sm:$0xff] %vm1023_vm2, %v796_v20  ;;  %v788_v22 = vadd.f32 %v1732_v7, %v787_v21 }
 0x1a4   :  { %v1308_v23 = vpop.f32.mrf.mxu1 }
 0x1a5   :  { %1029 = vst.msk [vmem:[%s2059_s5 + $0x28] sm:$0xff] %vm1023_vm2, %v788_v22  ;;  %v809_v24 = vadd.f32 %v1308_v23, %v1732_v7 }
 0x1a6   :  { %v800_v25 = vpop.f32.mrf.mxu1 }
 0x1a7   :  { %1034 = vst.msk [vmem:[%s2059_s5 + $0x50] sm:$0xff] %vm1023_vm2, %v809_v24  ;;  %v801_v26 = vadd.f32 %v1732_v7, %v800_v25 }
 0x1a8   :  { %v1309_v27 = vpop.f32.mrf.mxu1 }
 0x1a9   :  { %1032 = vst.msk [vmem:[%s2059_s5 + $0x40] sm:$0xff] %vm1023_vm2, %v801_v26  ;;  %v812_v28 = vadd.f32 %v1309_v27, %v1732_v7 }
 0x1aa   :  { %v803_v29 = vpop.f32.mrf.mxu1 }
 0x1ab   :  { %1035 = vst.msk [vmem:[%s2059_s5 + $0x58] sm:$0xff] %vm1023_vm2, %v812_v28  ;;  %v804_v30 = vadd.f32 %v1732_v7, %v803_v29 }
 0x1ac   :  { %v1312_v31 = vpop.f32.mrf.mxu1 }
 0x1ad   :  { %1033 = vst.msk [vmem:[%s2059_s5 + $0x48] sm:$0xff] %vm1023_vm2, %v804_v30  ;;  %v825_v32 = vadd.f32 %v1312_v31, %v1732_v7 }
 0x1ae   :  { %v816_v33 = vpop.f32.mrf.mxu1 }
 0x1af   :  { %1038 = vst.msk [vmem:[%s2059_s5 + $0x70] sm:$0xff] %vm1023_vm2, %v825_v32  ;;  %v817_v34 = vadd.f32 %v1732_v7, %v816_v33 }
 0x1b0   :  { %v1313_v35 = vpop.f32.mrf.mxu1 }
 0x1b1   :  { %1036 = vst.msk [vmem:[%s2059_s5 + $0x60] sm:$0xff] %vm1023_vm2, %v817_v34  ;;  %v828_v36 = vadd.f32 %v1313_v35, %v1732_v7 }
 0x1b2   :  { %v819_v38 = vpop.f32.mrf.mxu1 }
 0x1b3   :  { %1039 = vst.msk [vmem:[%s2059_s5 + $0x78] sm:$0xff] %vm1023_vm2, %v828_v36  ;;  %v820_v39 = vadd.f32 %v1732_v7, %v819_v38 }
 0x1b4   :  { %v1316_v40 = vpop.f32.mrf.mxu1 }
 0x1b5   :  { %1037 = vst.msk [vmem:[%s2059_s5 + $0x68] sm:$0xff] %vm1023_vm2, %v820_v39  ;;  %v841_v41 = vadd.f32 %v1316_v40, %v1732_v7 }
 0x1b6   :  { %v832_v42 = vpop.f32.mrf.mxu1 }
 0x1b7   :  { %1042 = vst.msk [vmem:[%s2059_s5 + $0x90] sm:$0xff] %vm1023_vm2, %v841_v41  ;;  %v833_v43 = vadd.f32 %v1732_v7, %v832_v42 }
 0x1b8   :  { %v1317_v44 = vpop.f32.mrf.mxu1 }
 0x1b9   :  { %1040 = vst.msk [vmem:[%s2059_s5 + $0x80] sm:$0xff] %vm1023_vm2, %v833_v43  ;;  %v844_v45 = vadd.f32 %v1317_v44, %v1732_v7 }
 0x1ba   :  { %v835_v46 = vpop.f32.mrf.mxu1 }
 0x1bb   :  { %1043 = vst.msk [vmem:[%s2059_s5 + $0x98] sm:$0xff] %vm1023_vm2, %v844_v45  ;;  %v836_v47 = vadd.f32 %v1732_v7, %v835_v46 }
 0x1bc   :  { %v1320_v48 = vpop.f32.mrf.mxu1 }
 0x1bd   :  { %1041 = vst.msk [vmem:[%s2059_s5 + $0x88] sm:$0xff] %vm1023_vm2, %v836_v47  ;;  %v857_v49 = vadd.f32 %v1320_v48, %v1732_v7 }
 0x1be   :  { %v848_v50 = vpop.f32.mrf.mxu1 }
 0x1bf   :  { %1046 = vst.msk [vmem:[%s2059_s5 + $0xb0] sm:$0xff] %vm1023_vm2, %v857_v49  ;;  %v849_v51 = vadd.f32 %v1732_v7, %v848_v50 }
 0x1c0   :  { %v1321_v52 = vpop.f32.mrf.mxu1 }
 0x1c1   :  { %1044 = vst.msk [vmem:[%s2059_s5 + $0xa0] sm:$0xff] %vm1023_vm2, %v849_v51  ;;  %v860_v53 = vadd.f32 %v1321_v52, %v1732_v7 }
 0x1c2   :  { %v851_v54 = vpop.f32.mrf.mxu1 }
 0x1c3   :  { %1047 = vst.msk [vmem:[%s2059_s5 + $0xb8] sm:$0xff] %vm1023_vm2, %v860_v53  ;;  %v852_v55 = vadd.f32 %v1732_v7, %v851_v54 }
 0x1c4   :  { %v1324_v56 = vpop.f32.mrf.mxu1 }
 0x1c5   :  { %1045 = vst.msk [vmem:[%s2059_s5 + $0xa8] sm:$0xff] %vm1023_vm2, %v852_v55  ;;  %v873_v57 = vadd.f32 %v1324_v56, %v1732_v7 }
 0x1c6   :  { %v864_v58 = vpop.f32.mrf.mxu1 }
 0x1c7   :  { %1050 = vst.msk [vmem:[%s2059_s5 + $0xd0] sm:$0xff] %vm1023_vm2, %v873_v57  ;;  %v865_v59 = vadd.f32 %v1732_v7, %v864_v58 }
 0x1c8   :  { %v1325_v60 = vpop.f32.mrf.mxu1 }
 0x1c9   :  { %1048 = vst.msk [vmem:[%s2059_s5 + $0xc0] sm:$0xff] %vm1023_vm2, %v865_v59  ;;  %v876_v61 = vadd.f32 %v1325_v60, %v1732_v7 }
 0x1ca   :  { %v867_v62 = vpop.f32.mrf.mxu1 }
 0x1cb   :  { %1051 = vst.msk [vmem:[%s2059_s5 + $0xd8] sm:$0xff] %vm1023_vm2, %v876_v61  ;;  %v868_v63 = vadd.f32 %v1732_v7, %v867_v62 }
 0x1cc   :  { %v1328_v0 = vpop.f32.mrf.mxu1 }
 0x1cd   :  { %1049 = vst.msk [vmem:[%s2059_s5 + $0xc8] sm:$0xff] %vm1023_vm2, %v868_v63  ;;  %v889_v1 = vadd.f32 %v1328_v0, %v1732_v7 }
 0x1ce   :  { %v880_v2 = vpop.f32.mrf.mxu1 }
 0x1cf   :  { %1054 = vst.msk [vmem:[%s2059_s5 + $0xf0] sm:$0xff] %vm1023_vm2, %v889_v1  ;;  %v881_v3 = vadd.f32 %v1732_v7, %v880_v2 }
 0x1d0   :  { %v1329_v4 = vpop.f32.mrf.mxu1 }
 0x1d1   :  { %1052 = vst.msk [vmem:[%s2059_s5 + $0xe0] sm:$0xff] %vm1023_vm2, %v881_v3  ;;  %v892_v5 = vadd.f32 %v1329_v4, %v1732_v7 }
 0x1d2   :  { %v883_v6 = vpop.f32.mrf.mxu1 }
 0x1d3   :  { %1055 = vst.msk [vmem:[%s2059_s5 + $0xf8] sm:$0xff] %vm1023_vm2, %v892_v5  ;;  %v884_v8 = vadd.f32 %v1732_v7, %v883_v6 }
 0x1d4   :  { %v1332_v9 = vpop.f32.mrf.mxu1 }
 0x1d5   :  { %1053 = vst.msk [vmem:[%s2059_s5 + $0xe8] sm:$0xff] %vm1023_vm2, %v884_v8  ;;  %v905_v37 = vadd.f32 %v1332_v9, %v1732_v7 }
 0x1d6   :  { %v896_v10 = vpop.f32.mrf.mxu1 }
 0x1d7   :  { %1058 = vst.msk [vmem:[%s2059_s5 + $0x110] sm:$0xff] %vm1023_vm2, %v905_v37  ;;  %v897_v11 = vadd.f32 %v1732_v7, %v896_v10 }
 0x1d8   :  { %v1333_v12 = vpop.f32.mrf.mxu1 }
 0x1d9   :  { %1056 = vst.msk [vmem:[%s2059_s5 + $0x100] sm:$0xff] %vm1023_vm2, %v897_v11  ;;  %v908_v13 = vadd.f32 %v1333_v12, %v1732_v7 }
 0x1da   :  { %v899_v14 = vpop.f32.mrf.mxu1 }
 0x1db   :  { %1059 = vst.msk [vmem:[%s2059_s5 + $0x118] sm:$0xff] %vm1023_vm2, %v908_v13  ;;  %v900_v15 = vadd.f32 %v1732_v7, %v899_v14 }
 0x1dc   :  { %v1336_v16 = vpop.f32.mrf.mxu1 }
 0x1dd   :  { %1057 = vst.msk [vmem:[%s2059_s5 + $0x108] sm:$0xff] %vm1023_vm2, %v900_v15  ;;  %v921_v17 = vadd.f32 %v1336_v16, %v1732_v7 }
 0x1de   :  { %v912_v18 = vpop.f32.mrf.mxu1 }
 0x1df   :  { %1062 = vst.msk [vmem:[%s2059_s5 + $0x130] sm:$0xff] %vm1023_vm2, %v921_v17  ;;  %v913_v19 = vadd.f32 %v1732_v7, %v912_v18 }
 0x1e0   :  { %v1337_v20 = vpop.f32.mrf.mxu1 }
 0x1e1   :  { %1060 = vst.msk [vmem:[%s2059_s5 + $0x120] sm:$0xff] %vm1023_vm2, %v913_v19  ;;  %v924_v21 = vadd.f32 %v1337_v20, %v1732_v7 }
 0x1e2   :  { %v915_v22 = vpop.f32.mrf.mxu1 }
 0x1e3   :  { %1063 = vst.msk [vmem:[%s2059_s5 + $0x138] sm:$0xff] %vm1023_vm2, %v924_v21  ;;  %v916_v23 = vadd.f32 %v1732_v7, %v915_v22 }
 0x1e4   :  { %v1340_v24 = vpop.f32.mrf.mxu1 }
 0x1e5   :  { %1061 = vst.msk [vmem:[%s2059_s5 + $0x128] sm:$0xff] %vm1023_vm2, %v916_v23  ;;  %v937_v25 = vadd.f32 %v1340_v24, %v1732_v7 }
 0x1e6   :  { %v928_v26 = vpop.f32.mrf.mxu1 }
 0x1e7   :  { %1066 = vst.msk [vmem:[%s2059_s5 + $0x150] sm:$0xff] %vm1023_vm2, %v937_v25  ;;  %v929_v27 = vadd.f32 %v1732_v7, %v928_v26 }
 0x1e8   :  { %v1341_v28 = vpop.f32.mrf.mxu1 }
 0x1e9   :  { %1064 = vst.msk [vmem:[%s2059_s5 + $0x140] sm:$0xff] %vm1023_vm2, %v929_v27  ;;  %v940_v29 = vadd.f32 %v1341_v28, %v1732_v7 }
 0x1ea   :  { %v931_v30 = vpop.f32.mrf.mxu1 }
 0x1eb   :  { %1067 = vst.msk [vmem:[%s2059_s5 + $0x158] sm:$0xff] %vm1023_vm2, %v940_v29  ;;  %v932_v31 = vadd.f32 %v1732_v7, %v931_v30 }
 0x1ec   :  { %v1344_v32 = vpop.f32.mrf.mxu1 }
 0x1ed   :  { %1065 = vst.msk [vmem:[%s2059_s5 + $0x148] sm:$0xff] %vm1023_vm2, %v932_v31  ;;  %v953_v33 = vadd.f32 %v1344_v32, %v1732_v7 }
 0x1ee   :  { %v944_v34 = vpop.f32.mrf.mxu1 }
 0x1ef   :  { %1070 = vst.msk [vmem:[%s2059_s5 + $0x170] sm:$0xff] %vm1023_vm2, %v953_v33  ;;  %v945_v35 = vadd.f32 %v1732_v7, %v944_v34 }
 0x1f0   :  { %v1345_v36 = vpop.f32.mrf.mxu1 }
 0x1f1   :  { %1068 = vst.msk [vmem:[%s2059_s5 + $0x160] sm:$0xff] %vm1023_vm2, %v945_v35  ;;  %v956_v38 = vadd.f32 %v1345_v36, %v1732_v7 }
 0x1f2   :  { %v947_v39 = vpop.f32.mrf.mxu1 }
 0x1f3   :  { %1071 = vst.msk [vmem:[%s2059_s5 + $0x178] sm:$0xff] %vm1023_vm2, %v956_v38  ;;  %v948_v40 = vadd.f32 %v1732_v7, %v947_v39 }
 0x1f4   :  { %v1348_v41 = vpop.f32.mrf.mxu1 }
 0x1f5   :  { %1069 = vst.msk [vmem:[%s2059_s5 + $0x168] sm:$0xff] %vm1023_vm2, %v948_v40  ;;  %v969_v42 = vadd.f32 %v1348_v41, %v1732_v7 }
 0x1f6   :  { %v960_v43 = vpop.f32.mrf.mxu1 }
 0x1f7   :  { %1074 = vst.msk [vmem:[%s2059_s5 + $0x190] sm:$0xff] %vm1023_vm2, %v969_v42  ;;  %v961_v44 = vadd.f32 %v1732_v7, %v960_v43 }
 0x1f8   :  { %v1349_v45 = vpop.f32.mrf.mxu1 }
 0x1f9   :  { %1072 = vst.msk [vmem:[%s2059_s5 + $0x180] sm:$0xff] %vm1023_vm2, %v961_v44  ;;  %v972_v46 = vadd.f32 %v1349_v45, %v1732_v7 }
 0x1fa   :  { %v963_v47 = vpop.f32.mrf.mxu1 }
 0x1fb   :  { %1075 = vst.msk [vmem:[%s2059_s5 + $0x198] sm:$0xff] %vm1023_vm2, %v972_v46  ;;  %v964_v48 = vadd.f32 %v1732_v7, %v963_v47 }
 0x1fc   :  { %v1352_v49 = vpop.f32.mrf.mxu1 }
 0x1fd   :  { %1073 = vst.msk [vmem:[%s2059_s5 + $0x188] sm:$0xff] %vm1023_vm2, %v964_v48  ;;  %v985_v50 = vadd.f32 %v1352_v49, %v1732_v7 }
 0x1fe   :  { %v976_v51 = vpop.f32.mrf.mxu1 }
 0x1ff   :  { %1078 = vst.msk [vmem:[%s2059_s5 + $0x1b0] sm:$0xff] %vm1023_vm2, %v985_v50  ;;  %v977_v52 = vadd.f32 %v1732_v7, %v976_v51 }
 0x200   :  { %v1353_v53 = vpop.f32.mrf.mxu1 }
 0x201   :  { %1076 = vst.msk [vmem:[%s2059_s5 + $0x1a0] sm:$0xff] %vm1023_vm2, %v977_v52  ;;  %v988_v54 = vadd.f32 %v1353_v53, %v1732_v7 }
 0x202   :  { %v979_v55 = vpop.f32.mrf.mxu1 }
 0x203   :  { %1079 = vst.msk [vmem:[%s2059_s5 + $0x1b8] sm:$0xff] %vm1023_vm2, %v988_v54  ;;  %v980_v56 = vadd.f32 %v1732_v7, %v979_v55 }
 0x204   :  { %v1356_v57 = vpop.f32.mrf.mxu1 }
 0x205   :  { %1077 = vst.msk [vmem:[%s2059_s5 + $0x1a8] sm:$0xff] %vm1023_vm2, %v980_v56  ;;  %v1001_v58 = vadd.f32 %v1356_v57, %v1732_v7 }
 0x206   :  { %v992_v59 = vpop.f32.mrf.mxu1 }
 0x207   :  { %1082 = vst.msk [vmem:[%s2059_s5 + $0x1d0] sm:$0xff] %vm1023_vm2, %v1001_v58  ;;  %v993_v60 = vadd.f32 %v1732_v7, %v992_v59 }
 0x208   :  { %v1357_v61 = vpop.f32.mrf.mxu1 }
 0x209   :  { %1080 = vst.msk [vmem:[%s2059_s5 + $0x1c0] sm:$0xff] %vm1023_vm2, %v993_v60  ;;  %v1004_v62 = vadd.f32 %v1357_v61, %v1732_v7 }
 0x20a   :  { %v995_v63 = vpop.f32.mrf.mxu1 }
 0x20b   :  { %1083 = vst.msk [vmem:[%s2059_s5 + $0x1d8] sm:$0xff] %vm1023_vm2, %v1004_v62  ;;  %v996_v0 = vadd.f32 %v1732_v7, %v995_v63 }
 0x20c   :  { %v1360_v1 = vpop.f32.mrf.mxu1 }
 0x20d   :  { %1081 = vst.msk [vmem:[%s2059_s5 + $0x1c8] sm:$0xff] %vm1023_vm2, %v996_v0  ;;  %v1017_v2 = vadd.f32 %v1360_v1, %v1732_v7 }
 0x20e   :  { %v1008_v3 = vpop.f32.mrf.mxu1 }
 0x20f   :  { %1086 = vst.msk [vmem:[%s2059_s5 + $0x1f0] sm:$0xff] %vm1023_vm2, %v1017_v2  ;;  %v1009_v4 = vadd.f32 %v1732_v7, %v1008_v3 }
 0x210   :  { %v1361_v5 = vpop.f32.mrf.mxu1 }
 0x211   :  { %1084 = vst.msk [vmem:[%s2059_s5 + $0x1e0] sm:$0xff] %vm1023_vm2, %v1009_v4  ;;  %v1020_v6 = vadd.f32 %v1361_v5, %v1732_v7 }
 0x212   :  { %v1011_v8 = vpop.f32.mrf.mxu1 }
 0x213   :  { %1087 = vst.msk [vmem:[%s2059_s5 + $0x1f8] sm:$0xff] %vm1023_vm2, %v1020_v6  ;;  %v1012_v9 = vadd.f32 %v1732_v7, %v1011_v8 }
 0x215   :  { %1085 = vst.msk [vmem:[%s2059_s5 + $0x1e8] sm:$0xff] %vm1023_vm2, %v1012_v9 }

// kernel: tpu_custom_call.1
= control target key start
LH: loop header
LB: loop body
LE: loop exit
PB: predicated region body
PF: predicated region fallthrough
CT: control target
= control target key end

     0   :  { %vm132_vm0 = vcmask 130048   ;;  %vm637_vm1 = vcmask 261120   ;;  %vm1023_vm2 = vcmask 64512   ;;  %s2054_s1 = inlined_call_operand.vmem [shape: bf16[16,32], index: 1, kind: input, shape index: {}]   ;;  %s2055_s0 = inlined_call_operand.vmem [shape: f32[512,16], index: 0, kind: input, shape index: {}]   ;;  %s2056_s3 = inlined_call_operand.vmem [shape: bf16[32,8], index: 3, kind: input, shape index: {}]   ;;  %s2057_s2 = inlined_call_operand.vmem [shape: f32[1,32], index: 2, kind: input, shape index: {}]   ;;  %s2058_s4 = inlined_call_operand.vmem [shape: f32[1,8], index: 4, kind: input, shape index: {}]   ;;  %s2059_s5 = inlined_call_operand.vmem [shape: f32[512,8], index: 5, kind: output, shape index: {}]  }
   0x1   :  { %v1362_v0 = vld [vmem:[%s2054_s1] sm:$0xff]   ;;  %v22_v2 = vld [vmem:[%s2055_s0 + $0x8] sm:$0xff]  ;;  %v23_v3 = vld [vmem:[%s2055_s0 + $0x10] sm:$0xff] }
   0x2   :  { %v21_v1 = vld [vmem:[%s2055_s0] sm:$0xff]  ;;  %1228 = vmatprep.subr.bf16.mxu0 %v1362_v0  ;;  %v24_v5 = vld [vmem:[%s2055_s0 + $0x18] sm:$0xff]  ;;  %v26_v7 = vld [vmem:[%s2055_s0 + $0x28] sm:$0xff] }
   0x3   :  { %v85_v4 = vpack.c.bf16 %v22_v2, %v21_v1  ;;  %v25_v6 = vld [vmem:[%s2055_s0 + $0x20] sm:$0xff]  ;;  %1229 = vmatpush3.bf16.msra.mxu0 %v1362_v0  ;;  %v86_v8 = vpack.c.bf16 %v24_v5, %v23_v3  ;;  %v27_v10 = vld [vmem:[%s2055_s0 + $0x30] sm:$0xff]  ;;  %v28_v11 = vld [vmem:[%s2055_s0 + $0x38] sm:$0xff] }
   0x4   :  { %v87_v9 = vpack.c.bf16 %v26_v7, %v25_v6  ;;  %v29_v12 = vld [vmem:[%s2055_s0 + $0x40] sm:$0xff]  ;;  %v30_v13 = vld [vmem:[%s2055_s0 + $0x48] sm:$0xff]  ;;  %v88_v14 = vpack.c.bf16 %v28_v11, %v27_v10  ;;  %v31_v16 = vld [vmem:[%s2055_s0 + $0x50] sm:$0xff] }
   0x5   :  { %1230 = vmatprep.mubr.msk.bf16.mxu0 %vm132_vm0, %v85_v4  ;;  %v89_v15 = vpack.c.bf16 %v30_v13, %v29_v12  ;;  %v32_v17 = vld [vmem:[%s2055_s0 + $0x58] sm:$0xff]  ;;  %v33_v18 = vld [vmem:[%s2055_s0 + $0x60] sm:$0xff]  ;;  %v34_v19 = vld [vmem:[%s2055_s0 + $0x68] sm:$0xff] }
   0x6   :  { %1231 = vmatmul.mubr.msk.bf16.vlgmr.msra.gmra.mxu0 %vm132_vm0, %v86_v8  ;;  %v90_v20 = vpack.c.bf16 %v32_v17, %v31_v16  ;;  %v91_v21 = vpack.c.bf16 %v34_v19, %v33_v18  ;;  %v35_v22 = vld [vmem:[%s2055_s0 + $0x70] sm:$0xff]  ;;  %v36_v23 = vld [vmem:[%s2055_s0 + $0x78] sm:$0xff]  ;;  %v37_v24 = vld [vmem:[%s2055_s0 + $0x80] sm:$0xff] }
   0x7   :  { %1234 = vmatprep.mubr.msk.bf16.mxu0 %vm132_vm0, %v87_v9  ;;  %v38_v25 = vld [vmem:[%s2055_s0 + $0x88] sm:$0xff]  ;;  %v92_v26 = vpack.c.bf16 %v36_v23, %v35_v22  ;;  %v39_v28 = vld [vmem:[%s2055_s0 + $0x90] sm:$0xff]  ;;  %v40_v29 = vld [vmem:[%s2055_s0 + $0x98] sm:$0xff] }
   0x8   :  { %v93_v27 = vpack.c.bf16 %v38_v25, %v37_v24  ;;  %v41_v30 = vld [vmem:[%s2055_s0 + $0xa0] sm:$0xff]  ;;  %v42_v31 = vld [vmem:[%s2055_s0 + $0xa8] sm:$0xff]  ;;  %v94_v32 = vpack.c.bf16 %v40_v29, %v39_v28  ;;  %v43_v34 = vld [vmem:[%s2055_s0 + $0xb0] sm:$0xff] }
   0x9   :  { %v95_v33 = vpack.c.bf16 %v42_v31, %v41_v30  ;;  %v44_v35 = vld [vmem:[%s2055_s0 + $0xb8] sm:$0xff]  ;;  %v45_v36 = vld [vmem:[%s2055_s0 + $0xc0] sm:$0xff]  ;;  %v46_v37 = vld [vmem:[%s2055_s0 + $0xc8] sm:$0xff] }
   0xa   :  { %v96_v38 = vpack.c.bf16 %v44_v35, %v43_v34  ;;  %v97_v39 = vpack.c.bf16 %v46_v37, %v45_v36  ;;  %v47_v40 = vld [vmem:[%s2055_s0 + $0xd0] sm:$0xff]  ;;  %v48_v41 = vld [vmem:[%s2055_s0 + $0xd8] sm:$0xff]  ;;  %v49_v42 = vld [vmem:[%s2055_s0 + $0xe0] sm:$0xff] }
   0xb   :  { %v50_v43 = vld [vmem:[%s2055_s0 + $0xe8] sm:$0xff]  ;;  %v98_v44 = vpack.c.bf16 %v48_v41, %v47_v40  ;;  %v51_v46 = vld [vmem:[%s2055_s0 + $0xf0] sm:$0xff]  ;;  %v52_v47 = vld [vmem:[%s2055_s0 + $0xf8] sm:$0xff] }
   0xc   :  { %v99_v45 = vpack.c.bf16 %v50_v43, %v49_v42  ;;  %v53_v48 = vld [vmem:[%s2055_s0 + $0x100] sm:$0xff]  ;;  %v54_v49 = vld [vmem:[%s2055_s0 + $0x108] sm:$0xff]  ;;  %v100_v50 = vpack.c.bf16 %v52_v47, %v51_v46  ;;  %v55_v52 = vld [vmem:[%s2055_s0 + $0x110] sm:$0xff] }
   0xd   :  { %v101_v51 = vpack.c.bf16 %v54_v49, %v53_v48  ;;  %v56_v53 = vld [vmem:[%s2055_s0 + $0x118] sm:$0xff]  ;;  %v57_v54 = vld [vmem:[%s2055_s0 + $0x120] sm:$0xff]  ;;  %v58_v55 = vld [vmem:[%s2055_s0 + $0x128] sm:$0xff] }
   0xe   :  { %1235 = vmatmul.mubr.msk.bf16.gmra.mxu0 %vm132_vm0, %v88_v14  ;;  %v102_v56 = vpack.c.bf16 %v56_v53, %v55_v52  ;;  %v103_v57 = vpack.c.bf16 %v58_v55, %v57_v54  ;;  %v59_v58 = vld [vmem:[%s2055_s0 + $0x130] sm:$0xff]  ;;  %v60_v59 = vld [vmem:[%s2055_s0 + $0x138] sm:$0xff]  ;;  %v61_v60 = vld [vmem:[%s2055_s0 + $0x140] sm:$0xff] }
   0xf   :  { %1238 = vmatprep.mubr.msk.bf16.mxu0 %vm132_vm0, %v89_v15  ;;  %v62_v61 = vld [vmem:[%s2055_s0 + $0x148] sm:$0xff]  ;;  %v104_v62 = vpack.c.bf16 %v60_v59, %v59_v58  ;;  %v1364_v1 = vld [vmem:[%s2056_s3] sm:$0xff]   ;;  %v63_v2 = vld [vmem:[%s2055_s0 + $0x150] sm:$0xff] }
  0x10   :  { %v1363_v63 = vld [vmem:[%s2056_s3 + $0x8] sm:$0xff]   ;;  %v105_v0 = vpack.c.bf16 %v62_v61, %v61_v60  ;;  %v64_v3 = vld [vmem:[%s2055_s0 + $0x158] sm:$0xff]  ;;  %v65_v4 = vld [vmem:[%s2055_s0 + $0x160] sm:$0xff] }
  0x11   :  { %1294 = vmatprep.subr.bf16.mxu1 %v1363_v63  ;;  %v66_v5 = vld [vmem:[%s2055_s0 + $0x168] sm:$0xff]  ;;  %v106_v6 = vpack.c.bf16 %v64_v3, %v63_v2  ;;  %v67_v8 = vld [vmem:[%s2055_s0 + $0x170] sm:$0xff]  ;;  %v68_v9 = vld [vmem:[%s2055_s0 + $0x178] sm:$0xff] }
  0x12   :  { %1295 = vmatpush3.bf16.msra.mxu1 %v1363_v63  ;;  %v107_v7 = vpack.c.bf16 %v66_v5, %v65_v4  ;;  %v69_v10 = vld [vmem:[%s2055_s0 + $0x180] sm:$0xff]  ;;  %v70_v11 = vld [vmem:[%s2055_s0 + $0x188] sm:$0xff]  ;;  %v108_v12 = vpack.c.bf16 %v68_v9, %v67_v8  ;;  %v71_v14 = vld [vmem:[%s2055_s0 + $0x190] sm:$0xff] }
  0x13   :  { %1296 = vmatprep.subr.bf16.mxu1 %v1364_v1  ;;  %v109_v13 = vpack.c.bf16 %v70_v11, %v69_v10  ;;  %v72_v15 = vld [vmem:[%s2055_s0 + $0x198] sm:$0xff]  ;;  %v73_v16 = vld [vmem:[%s2055_s0 + $0x1a0] sm:$0xff]  ;;  %v74_v17 = vld [vmem:[%s2055_s0 + $0x1a8] sm:$0xff] }
  0x14   :  { %v110_v18 = vpack.c.bf16 %v72_v15, %v71_v14  ;;  %v111_v19 = vpack.c.bf16 %v74_v17, %v73_v16  ;;  %v77_v22 = vld [vmem:[%s2055_s0 + $0x1c0] sm:$0xff]  ;;  %v78_v23 = vld [vmem:[%s2055_s0 + $0x1c8] sm:$0xff] }
  0x15   :  { %v113_v25 = vpack.c.bf16 %v78_v23, %v77_v22  ;;  %v81_v28 = vld [vmem:[%s2055_s0 + $0x1e0] sm:$0xff]  ;;  %v82_v29 = vld [vmem:[%s2055_s0 + $0x1e8] sm:$0xff] }
  0x16   :  { %1239 = vmatmul.mubr.msk.bf16.gmra.mxu0 %vm132_vm0, %v90_v20  ;;  %1297 = vmatpush3.bf16.msra.mxu1 %v1364_v1  ;;  %v75_v20 = vld [vmem:[%s2055_s0 + $0x1b0] sm:$0xff]  ;;  %v115_v31 = vpack.c.bf16 %v82_v29, %v81_v28  ;;  %v1631_v37 = vld [vmem:[%s2057_s2] ss:$0 sm:$0xff] }
  0x17   :  { %1242 = vmatprep.mubr.msk.bf16.mxu0 %vm132_vm0, %v91_v21  ;;  %v76_v21 = vld [vmem:[%s2055_s0 + $0x1b8] sm:$0xff] }
  0x18   :  { %v112_v24 = vpack.c.bf16 %v76_v21, %v75_v20 }
  0x1e   :  { %1243 = vmatmul.mubr.msk.bf16.gmra.mxu0 %vm132_vm0, %v92_v26  ;;  %v79_v26 = vld [vmem:[%s2055_s0 + $0x1d0] sm:$0xff] }
  0x1f   :  { %1246 = vmatprep.mubr.msk.bf16.mxu0 %vm132_vm0, %v93_v27  ;;  %v80_v27 = vld [vmem:[%s2055_s0 + $0x1d8] sm:$0xff] }
  0x20   :  { %v114_v30 = vpack.c.bf16 %v80_v27, %v79_v26 }
  0x26   :  { %1247 = vmatmul.mubr.msk.bf16.gmra.mxu0 %vm132_vm0, %v94_v32  ;;  %v83_v32 = vld [vmem:[%s2055_s0 + $0x1f0] sm:$0xff] }
  0x27   :  { %1250 = vmatprep.mubr.msk.bf16.mxu0 %vm132_vm0, %v95_v33  ;;  %v84_v33 = vld [vmem:[%s2055_s0 + $0x1f8] sm:$0xff] }
  0x28   :  { %v116_v34 = vpack.c.bf16 %v84_v33, %v83_v32 }
  0x2e   :  { %1251 = vmatmul.mubr.msk.bf16.gmra.mxu0 %vm132_vm0, %v96_v38 }
  0x2f   :  { %1254 = vmatprep.mubr.msk.bf16.mxu0 %vm132_vm0, %v97_v39 }
  0x36   :  { %1255 = vmatmul.mubr.msk.bf16.gmra.mxu0 %vm132_vm0, %v98_v44 }
  0x37   :  { %1258 = vmatprep.mubr.msk.bf16.mxu0 %vm132_vm0, %v99_v45 }
  0x3e   :  { %1259 = vmatmul.mubr.msk.bf16.gmra.mxu0 %vm132_vm0, %v100_v50 }
  0x3f   :  { %1262 = vmatprep.mubr.msk.bf16.mxu0 %vm132_vm0, %v101_v51 }
  0x46   :  { %1263 = vmatmul.mubr.msk.bf16.gmra.mxu0 %vm132_vm0, %v102_v56 }
  0x47   :  { %1266 = vmatprep.mubr.msk.bf16.mxu0 %vm132_vm0, %v103_v57 }
  0x4e   :  { %1267 = vmatmul.mubr.msk.bf16.gmra.mxu0 %vm132_vm0, %v104_v62 }
  0x4f   :  { %1270 = vmatprep.mubr.msk.bf16.mxu0 %vm132_vm0, %v105_v0 }
  0x56   :  { %1271 = vmatmul.mubr.msk.bf16.gmra.mxu0 %vm132_vm0, %v106_v6 }
  0x57   :  { %1274 = vmatprep.mubr.msk.bf16.mxu0 %vm132_vm0, %v107_v7 }
  0x5e   :  { %1275 = vmatmul.mubr.msk.bf16.gmra.mxu0 %vm132_vm0, %v108_v12 }
  0x5f   :  { %1278 = vmatprep.mubr.msk.bf16.mxu0 %vm132_vm0, %v109_v13 }
  0x66   :  { %1279 = vmatmul.mubr.msk.bf16.gmra.mxu0 %vm132_vm0, %v110_v18 }
  0x67   :  { %1282 = vmatprep.mubr.msk.bf16.mxu0 %vm132_vm0, %v111_v19 }
  0x6e   :  { %1283 = vmatmul.mubr.msk.bf16.gmra.mxu0 %vm132_vm0, %v112_v24 }
  0x6f   :  { %1286 = vmatprep.mubr.msk.bf16.mxu0 %vm132_vm0, %v113_v25 }
  0x76   :  { %1287 = vmatmul.mubr.msk.bf16.gmra.mxu0 %vm132_vm0, %v114_v30 }
  0x77   :  { %1290 = vmatprep.mubr.msk.bf16.mxu0 %vm132_vm0, %v115_v31 }
  0x7e   :  { %1291 = vmatmul.mubr.msk.bf16.gmra.mxu0 %vm132_vm0, %v116_v34 }
  0xc6   :  { %v1232_v35 = vpop.f32.mrf.mxu0 }
  0xc7   :  { %v272_v41 = vadd.f32 %v1232_v35, %v1631_v37 }
  0xc8   :  { %v263_v36 = vpop.f32.mrf.mxu0 }
  0xc9   :  { %v264_v39 = vadd.f32 %v1631_v37, %v263_v36  ;;  %v520_v48 = vmax.f32 %v272_v41, 0.0 }
  0xca   :  { %v1233_v38 = vpop.f32.mrf.mxu0 }
  0xcb   :  { %v275_v40 = vadd.f32 %v1233_v38, %v1631_v37  ;;  %v518_v46 = vmax.f32 %v264_v39, 0.0 }
  0xcc   :  { %v266_v42 = vpop.f32.mrf.mxu0 }
  0xcd   :  { %v267_v43 = vadd.f32 %v1631_v37, %v266_v42  ;;  %v521_v44 = vmax.f32 %v275_v40, 0.0 }
  0xce   :  { %v1236_v45 = vpop.f32.mrf.mxu0 }
  0xcf   :  { %v519_v47 = vmax.f32 %v267_v43, 0.0  ;;  %v583_v51 = vpack.c.bf16 %v521_v44, %v520_v48  ;;  %v288_v55 = vadd.f32 %v1236_v45, %v1631_v37 }
  0xd0   :  { %v279_v49 = vpop.f32.mrf.mxu0 }
  0xd1   :  { %v582_v50 = vpack.c.bf16 %v519_v47, %v518_v46  ;;  %v280_v53 = vadd.f32 %v1631_v37, %v279_v49  ;;  %v524_v62 = vmax.f32 %v288_v55, 0.0 }
  0xd2   :  { %v1237_v52 = vpop.f32.mrf.mxu0 }
  0xd3   :  { %v291_v54 = vadd.f32 %v1237_v52, %v1631_v37  ;;  %1298 = vmatprep.mubr.msk.bf16.mxu1 %vm637_vm1, %v582_v50  ;;  %v522_v60 = vmax.f32 %v280_v53, 0.0 }
  0xd4   :  { %v282_v56 = vpop.f32.mrf.mxu0  ;;  %1299 = vmatmul.mubr.msk.bf16.vlgmr.msra.gmra.mxu1 %vm637_vm1, %v583_v51 }
  0xd5   :  { %v283_v57 = vadd.f32 %v1631_v37, %v282_v56  ;;  %v525_v58 = vmax.f32 %v291_v54, 0.0 }
  0xd6   :  { %v1240_v59 = vpop.f32.mrf.mxu0 }
  0xd7   :  { %v523_v61 = vmax.f32 %v283_v57, 0.0  ;;  %v585_v1 = vpack.c.bf16 %v525_v58, %v524_v62  ;;  %v304_v5 = vadd.f32 %v1240_v59, %v1631_v37 }
  0xd8   :  { %v295_v63 = vpop.f32.mrf.mxu0 }
  0xd9   :  { %v584_v0 = vpack.c.bf16 %v523_v61, %v522_v60  ;;  %v296_v3 = vadd.f32 %v1631_v37, %v295_v63  ;;  %v528_v12 = vmax.f32 %v304_v5, 0.0 }
  0xda   :  { %v1241_v2 = vpop.f32.mrf.mxu0 }
  0xdb   :  { %v307_v4 = vadd.f32 %v1241_v2, %v1631_v37  ;;  %1302 = vmatprep.mubr.msk.bf16.mxu1 %vm637_vm1, %v584_v0  ;;  %v526_v10 = vmax.f32 %v296_v3, 0.0 }
  0xdc   :  { %v298_v6 = vpop.f32.mrf.mxu0  ;;  %1303 = vmatmul.mubr.msk.bf16.gmra.mxu1 %vm637_vm1, %v585_v1 }
  0xdd   :  { %v299_v7 = vadd.f32 %v1631_v37, %v298_v6  ;;  %v529_v8 = vmax.f32 %v307_v4, 0.0 }
  0xde   :  { %v1244_v9 = vpop.f32.mrf.mxu0 }
  0xdf   :  { %v527_v11 = vmax.f32 %v299_v7, 0.0  ;;  %v587_v15 = vpack.c.bf16 %v529_v8, %v528_v12  ;;  %v320_v19 = vadd.f32 %v1244_v9, %v1631_v37 }
  0xe0   :  { %v311_v13 = vpop.f32.mrf.mxu0 }
  0xe1   :  { %v586_v14 = vpack.c.bf16 %v527_v11, %v526_v10  ;;  %v312_v17 = vadd.f32 %v1631_v37, %v311_v13  ;;  %v532_v26 = vmax.f32 %v320_v19, 0.0 }
  0xe2   :  { %v1245_v16 = vpop.f32.mrf.mxu0 }
  0xe3   :  { %v323_v18 = vadd.f32 %v1245_v16, %v1631_v37  ;;  %1306 = vmatprep.mubr.msk.bf16.mxu1 %vm637_vm1, %v586_v14  ;;  %v530_v24 = vmax.f32 %v312_v17, 0.0 }
  0xe4   :  { %v314_v20 = vpop.f32.mrf.mxu0  ;;  %1307 = vmatmul.mubr.msk.bf16.gmra.mxu1 %vm637_vm1, %v587_v15 }
  0xe5   :  { %v315_v21 = vadd.f32 %v1631_v37, %v314_v20  ;;  %v533_v22 = vmax.f32 %v323_v18, 0.0 }
  0xe6   :  { %v1248_v23 = vpop.f32.mrf.mxu0 }
  0xe7   :  { %v531_v25 = vmax.f32 %v315_v21, 0.0  ;;  %v589_v29 = vpack.c.bf16 %v533_v22, %v532_v26  ;;  %v336_v33 = vadd.f32 %v1248_v23, %v1631_v37 }
  0xe8   :  { %v327_v27 = vpop.f32.mrf.mxu0 }
  0xe9   :  { %v588_v28 = vpack.c.bf16 %v531_v25, %v530_v24  ;;  %v328_v31 = vadd.f32 %v1631_v37, %v327_v27  ;;  %v536_v41 = vmax.f32 %v336_v33, 0.0 }
  0xea   :  { %v1249_v30 = vpop.f32.mrf.mxu0 }
  0xeb   :  { %v339_v32 = vadd.f32 %v1249_v30, %v1631_v37  ;;  %1310 = vmatprep.mubr.msk.bf16.mxu1 %vm637_vm1, %v588_v28  ;;  %v534_v39 = vmax.f32 %v328_v31, 0.0 }
  0xec   :  { %v330_v34 = vpop.f32.mrf.mxu0  ;;  %1311 = vmatmul.mubr.msk.bf16.gmra.mxu1 %vm637_vm1, %v589_v29 }
  0xed   :  { %v331_v35 = vadd.f32 %v1631_v37, %v330_v34  ;;  %v537_v36 = vmax.f32 %v339_v32, 0.0 }
  0xee   :  { %v1252_v38 = vpop.f32.mrf.mxu0 }
  0xef   :  { %v535_v40 = vmax.f32 %v331_v35, 0.0  ;;  %v591_v44 = vpack.c.bf16 %v537_v36, %v536_v41  ;;  %v352_v48 = vadd.f32 %v1252_v38, %v1631_v37 }
  0xf0   :  { %v343_v42 = vpop.f32.mrf.mxu0 }
  0xf1   :  { %v590_v43 = vpack.c.bf16 %v535_v40, %v534_v39  ;;  %v344_v46 = vadd.f32 %v1631_v37, %v343_v42  ;;  %v540_v55 = vmax.f32 %v352_v48, 0.0 }
  0xf2   :  { %v1253_v45 = vpop.f32.mrf.mxu0 }
  0xf3   :  { %v355_v47 = vadd.f32 %v1253_v45, %v1631_v37  ;;  %1314 = vmatprep.mubr.msk.bf16.mxu1 %vm637_vm1, %v590_v43  ;;  %v538_v53 = vmax.f32 %v344_v46, 0.0 }
  0xf4   :  { %v346_v49 = vpop.f32.mrf.mxu0  ;;  %1315 = vmatmul.mubr.msk.bf16.gmra.mxu1 %vm637_vm1, %v591_v44 }
  0xf5   :  { %v347_v50 = vadd.f32 %v1631_v37, %v346_v49  ;;  %v541_v51 = vmax.f32 %v355_v47, 0.0 }
  0xf6   :  { %v1256_v52 = vpop.f32.mrf.mxu0 }
  0xf7   :  { %v539_v54 = vmax.f32 %v347_v50, 0.0  ;;  %v593_v58 = vpack.c.bf16 %v541_v51, %v540_v55  ;;  %v368_v62 = vadd.f32 %v1256_v52, %v1631_v37 }
  0xf8   :  { %v359_v56 = vpop.f32.mrf.mxu0 }
  0xf9   :  { %v592_v57 = vpack.c.bf16 %v539_v54, %v538_v53  ;;  %v360_v60 = vadd.f32 %v1631_v37, %v359_v56  ;;  %v544_v5 = vmax.f32 %v368_v62, 0.0 }
  0xfa   :  { %v1257_v59 = vpop.f32.mrf.mxu0 }
  0xfb   :  { %v371_v61 = vadd.f32 %v1257_v59, %v1631_v37  ;;  %1318 = vmatprep.mubr.msk.bf16.mxu1 %vm637_vm1, %v592_v57  ;;  %v542_v3 = vmax.f32 %v360_v60, 0.0 }
  0xfc   :  { %v362_v63 = vpop.f32.mrf.mxu0  ;;  %1319 = vmatmul.mubr.msk.bf16.gmra.mxu1 %vm637_vm1, %v593_v58 }
  0xfd   :  { %v363_v0 = vadd.f32 %v1631_v37, %v362_v63  ;;  %v545_v1 = vmax.f32 %v371_v61, 0.0 }
  0xfe   :  { %v1260_v2 = vpop.f32.mrf.mxu0 }
  0xff   :  { %v543_v4 = vmax.f32 %v363_v0, 0.0  ;;  %v595_v8 = vpack.c.bf16 %v545_v1, %v544_v5  ;;  %v384_v12 = vadd.f32 %v1260_v2, %v1631_v37 }
 0x100   :  { %v375_v6 = vpop.f32.mrf.mxu0 }
 0x101   :  { %v594_v7 = vpack.c.bf16 %v543_v4, %v542_v3  ;;  %v376_v10 = vadd.f32 %v1631_v37, %v375_v6  ;;  %v548_v19 = vmax.f32 %v384_v12, 0.0 }
 0x102   :  { %v1261_v9 = vpop.f32.mrf.mxu0 }
 0x103   :  { %v387_v11 = vadd.f32 %v1261_v9, %v1631_v37  ;;  %1322 = vmatprep.mubr.msk.bf16.mxu1 %vm637_vm1, %v594_v7  ;;  %v546_v17 = vmax.f32 %v376_v10, 0.0 }
 0x104   :  { %v378_v13 = vpop.f32.mrf.mxu0  ;;  %1323 = vmatmul.mubr.msk.bf16.gmra.mxu1 %vm637_vm1, %v595_v8 }
 0x105   :  { %v379_v14 = vadd.f32 %v1631_v37, %v378_v13  ;;  %v549_v15 = vmax.f32 %v387_v11, 0.0 }
 0x106   :  { %v1264_v16 = vpop.f32.mrf.mxu0 }
 0x107   :  { %v547_v18 = vmax.f32 %v379_v14, 0.0  ;;  %v597_v22 = vpack.c.bf16 %v549_v15, %v548_v19  ;;  %v400_v26 = vadd.f32 %v1264_v16, %v1631_v37 }
 0x108   :  { %v391_v20 = vpop.f32.mrf.mxu0 }
 0x109   :  { %v596_v21 = vpack.c.bf16 %v547_v18, %v546_v17  ;;  %v392_v24 = vadd.f32 %v1631_v37, %v391_v20  ;;  %v552_v33 = vmax.f32 %v400_v26, 0.0 }
 0x10a   :  { %v1265_v23 = vpop.f32.mrf.mxu0 }
 0x10b   :  { %v403_v25 = vadd.f32 %v1265_v23, %v1631_v37  ;;  %1326 = vmatprep.mubr.msk.bf16.mxu1 %vm637_vm1, %v596_v21  ;;  %v550_v31 = vmax.f32 %v392_v24, 0.0 }
 0x10c   :  { %v394_v27 = vpop.f32.mrf.mxu0  ;;  %1327 = vmatmul.mubr.msk.bf16.gmra.mxu1 %vm637_vm1, %v597_v22 }
 0x10d   :  { %v395_v28 = vadd.f32 %v1631_v37, %v394_v27  ;;  %v553_v29 = vmax.f32 %v403_v25, 0.0 }
 0x10e   :  { %v1268_v30 = vpop.f32.mrf.mxu0 }
 0x10f   :  { %v551_v32 = vmax.f32 %v395_v28, 0.0  ;;  %v599_v36 = vpack.c.bf16 %v553_v29, %v552_v33  ;;  %v416_v41 = vadd.f32 %v1268_v30, %v1631_v37 }
 0x110   :  { %v407_v34 = vpop.f32.mrf.mxu0 }
 0x111   :  { %v598_v35 = vpack.c.bf16 %v551_v32, %v550_v31  ;;  %v408_v39 = vadd.f32 %v1631_v37, %v407_v34  ;;  %v556_v48 = vmax.f32 %v416_v41, 0.0 }
 0x112   :  { %v1269_v38 = vpop.f32.mrf.mxu0 }
 0x113   :  { %v419_v40 = vadd.f32 %v1269_v38, %v1631_v37  ;;  %1330 = vmatprep.mubr.msk.bf16.mxu1 %vm637_vm1, %v598_v35  ;;  %v554_v46 = vmax.f32 %v408_v39, 0.0 }
 0x114   :  { %v410_v42 = vpop.f32.mrf.mxu0  ;;  %1331 = vmatmul.mubr.msk.bf16.gmra.mxu1 %vm637_vm1, %v599_v36 }
 0x115   :  { %v411_v43 = vadd.f32 %v1631_v37, %v410_v42  ;;  %v557_v44 = vmax.f32 %v419_v40, 0.0 }
 0x116   :  { %v1272_v45 = vpop.f32.mrf.mxu0 }
 0x117   :  { %v555_v47 = vmax.f32 %v411_v43, 0.0  ;;  %v601_v51 = vpack.c.bf16 %v557_v44, %v556_v48  ;;  %v432_v55 = vadd.f32 %v1272_v45, %v1631_v37 }
 0x118   :  { %v423_v49 = vpop.f32.mrf.mxu0 }
 0x119   :  { %v600_v50 = vpack.c.bf16 %v555_v47, %v554_v46  ;;  %v424_v53 = vadd.f32 %v1631_v37, %v423_v49  ;;  %v560_v62 = vmax.f32 %v432_v55, 0.0 }
 0x11a   :  { %v1273_v52 = vpop.f32.mrf.mxu0 }
 0x11b   :  { %v435_v54 = vadd.f32 %v1273_v52, %v1631_v37  ;;  %1334 = vmatprep.mubr.msk.bf16.mxu1 %vm637_vm1, %v600_v50  ;;  %v558_v60 = vmax.f32 %v424_v53, 0.0 }
 0x11c   :  { %v426_v56 = vpop.f32.mrf.mxu0  ;;  %1335 = vmatmul.mubr.msk.bf16.gmra.mxu1 %vm637_vm1, %v601_v51 }
 0x11d   :  { %v427_v57 = vadd.f32 %v1631_v37, %v426_v56  ;;  %v561_v58 = vmax.f32 %v435_v54, 0.0 }
 0x11e   :  { %v1276_v59 = vpop.f32.mrf.mxu0 }
 0x11f   :  { %v559_v61 = vmax.f32 %v427_v57, 0.0  ;;  %v603_v1 = vpack.c.bf16 %v561_v58, %v560_v62  ;;  %v448_v5 = vadd.f32 %v1276_v59, %v1631_v37 }
 0x120   :  { %v439_v63 = vpop.f32.mrf.mxu0 }
 0x121   :  { %v602_v0 = vpack.c.bf16 %v559_v61, %v558_v60  ;;  %v440_v3 = vadd.f32 %v1631_v37, %v439_v63  ;;  %v564_v12 = vmax.f32 %v448_v5, 0.0 }
 0x122   :  { %v1277_v2 = vpop.f32.mrf.mxu0 }
 0x123   :  { %v451_v4 = vadd.f32 %v1277_v2, %v1631_v37  ;;  %1338 = vmatprep.mubr.msk.bf16.mxu1 %vm637_vm1, %v602_v0  ;;  %v562_v10 = vmax.f32 %v440_v3, 0.0 }
 0x124   :  { %v442_v6 = vpop.f32.mrf.mxu0  ;;  %1339 = vmatmul.mubr.msk.bf16.gmra.mxu1 %vm637_vm1, %v603_v1 }
 0x125   :  { %v443_v7 = vadd.f32 %v1631_v37, %v442_v6  ;;  %v565_v8 = vmax.f32 %v451_v4, 0.0 }
 0x126   :  { %v1280_v9 = vpop.f32.mrf.mxu0 }
 0x127   :  { %v563_v11 = vmax.f32 %v443_v7, 0.0  ;;  %v605_v15 = vpack.c.bf16 %v565_v8, %v564_v12  ;;  %v464_v19 = vadd.f32 %v1280_v9, %v1631_v37  ;;  %v1732_v7 = vld [vmem:[%s2058_s4] ss:$0 sm:$0xff] }
 0x128   :  { %v455_v13 = vpop.f32.mrf.mxu0 }
 0x129   :  { %v604_v14 = vpack.c.bf16 %v563_v11, %v562_v10  ;;  %v456_v17 = vadd.f32 %v1631_v37, %v455_v13  ;;  %v568_v26 = vmax.f32 %v464_v19, 0.0 }
 0x12a   :  { %v1281_v16 = vpop.f32.mrf.mxu0 }
 0x12b   :  { %v467_v18 = vadd.f32 %v1281_v16, %v1631_v37  ;;  %1342 = vmatprep.mubr.msk.bf16.mxu1 %vm637_vm1, %v604_v14  ;;  %v566_v24 = vmax.f32 %v456_v17, 0.0 }
 0x12c   :  { %v458_v20 = vpop.f32.mrf.mxu0  ;;  %1343 = vmatmul.mubr.msk.bf16.gmra.mxu1 %vm637_vm1, %v605_v15 }
 0x12d   :  { %v459_v21 = vadd.f32 %v1631_v37, %v458_v20  ;;  %v569_v22 = vmax.f32 %v467_v18, 0.0 }
 0x12e   :  { %v1284_v23 = vpop.f32.mrf.mxu0 }
 0x12f   :  { %v567_v25 = vmax.f32 %v459_v21, 0.0  ;;  %v607_v29 = vpack.c.bf16 %v569_v22, %v568_v26  ;;  %v480_v33 = vadd.f32 %v1284_v23, %v1631_v37 }
 0x130   :  { %v471_v27 = vpop.f32.mrf.mxu0 }
 0x131   :  { %v606_v28 = vpack.c.bf16 %v567_v25, %v566_v24  ;;  %v472_v31 = vadd.f32 %v1631_v37, %v471_v27  ;;  %v572_v41 = vmax.f32 %v480_v33, 0.0 }
 0x132   :  { %v1285_v30 = vpop.f32.mrf.mxu0 }
 0x133   :  { %v483_v32 = vadd.f32 %v1285_v30, %v1631_v37  ;;  %1346 = vmatprep.mubr.msk.bf16.mxu1 %vm637_vm1, %v606_v28  ;;  %v570_v39 = vmax.f32 %v472_v31, 0.0 }
 0x134   :  { %v474_v34 = vpop.f32.mrf.mxu0  ;;  %1347 = vmatmul.mubr.msk.bf16.gmra.mxu1 %vm637_vm1, %v607_v29 }
 0x135   :  { %v475_v35 = vadd.f32 %v1631_v37, %v474_v34  ;;  %v573_v36 = vmax.f32 %v483_v32, 0.0 }
 0x136   :  { %v1288_v38 = vpop.f32.mrf.mxu0 }
 0x137   :  { %v571_v40 = vmax.f32 %v475_v35, 0.0  ;;  %v609_v44 = vpack.c.bf16 %v573_v36, %v572_v41  ;;  %v496_v48 = vadd.f32 %v1288_v38, %v1631_v37 }
 0x138   :  { %v487_v42 = vpop.f32.mrf.mxu0 }
 0x139   :  { %v608_v43 = vpack.c.bf16 %v571_v40, %v570_v39  ;;  %v488_v46 = vadd.f32 %v1631_v37, %v487_v42  ;;  %v576_v55 = vmax.f32 %v496_v48, 0.0 }
 0x13a   :  { %v1289_v45 = vpop.f32.mrf.mxu0 }
 0x13b   :  { %v499_v47 = vadd.f32 %v1289_v45, %v1631_v37  ;;  %1350 = vmatprep.mubr.msk.bf16.mxu1 %vm637_vm1, %v608_v43  ;;  %v574_v53 = vmax.f32 %v488_v46, 0.0 }
 0x13c   :  { %v490_v49 = vpop.f32.mrf.mxu0  ;;  %1351 = vmatmul.mubr.msk.bf16.gmra.mxu1 %vm637_vm1, %v609_v44 }
 0x13d   :  { %v491_v50 = vadd.f32 %v1631_v37, %v490_v49  ;;  %v577_v51 = vmax.f32 %v499_v47, 0.0 }
 0x13e   :  { %v1292_v52 = vpop.f32.mrf.mxu0 }
 0x13f   :  { %v575_v54 = vmax.f32 %v491_v50, 0.0  ;;  %v611_v58 = vpack.c.bf16 %v577_v51, %v576_v55  ;;  %v512_v62 = vadd.f32 %v1292_v52, %v1631_v37 }
 0x140   :  { %v503_v56 = vpop.f32.mrf.mxu0 }
 0x141   :  { %v610_v57 = vpack.c.bf16 %v575_v54, %v574_v53  ;;  %v504_v60 = vadd.f32 %v1631_v37, %v503_v56  ;;  %v580_v4 = vmax.f32 %v512_v62, 0.0 }
 0x142   :  { %v1293_v59 = vpop.f32.mrf.mxu0 }
 0x143   :  { %v515_v61 = vadd.f32 %v1293_v59, %v1631_v37  ;;  %1354 = vmatprep.mubr.msk.bf16.mxu1 %vm637_vm1, %v610_v57  ;;  %v578_v2 = vmax.f32 %v504_v60, 0.0 }
 0x144   :  { %v506_v63 = vpop.f32.mrf.mxu0  ;;  %1355 = vmatmul.mubr.msk.bf16.gmra.mxu1 %vm637_vm1, %v611_v58 }
 0x145   :  { %v507_v0 = vadd.f32 %v1631_v37, %v506_v63  ;;  %v581_v1 = vmax.f32 %v515_v61, 0.0 }
 0x147   :  { %v579_v3 = vmax.f32 %v507_v0, 0.0  ;;  %v613_v6 = vpack.c.bf16 %v581_v1, %v580_v4 }
 0x149   :  { %v612_v5 = vpack.c.bf16 %v579_v3, %v578_v2 }
 0x14b   :  { %1358 = vmatprep.mubr.msk.bf16.mxu1 %vm637_vm1, %v612_v5 }
 0x14c   :  { %1359 = vmatmul.mubr.msk.bf16.gmra.mxu1 %vm637_vm1, %v613_v6 }
 0x194   :  { %v1300_v8 = vpop.f32.mrf.mxu1 }
 0x195   :  { %v777_v9 = vadd.f32 %v1300_v8, %v1732_v7 }
 0x196   :  { %v768_v37 = vpop.f32.mrf.mxu1 }
 0x197   :  { %1026 = vst.msk [vmem:[%s2059_s5 + $0x10] sm:$0xff] %vm1023_vm2, %v777_v9  ;;  %v769_v10 = vadd.f32 %v1732_v7, %v768_v37 }
 0x198   :  { %v1301_v11 = vpop.f32.mrf.mxu1 }
 0x199   :  { %1024 = vst.msk [vmem:[%s2059_s5] sm:$0xff] %vm1023_vm2, %v769_v10  ;;  %v780_v12 = vadd.f32 %v1301_v11, %v1732_v7 }
 0x19a   :  { %v771_v13 = vpop.f32.mrf.mxu1 }
 0x19b   :  { %1027 = vst.msk [vmem:[%s2059_s5 + $0x18] sm:$0xff] %vm1023_vm2, %v780_v12  ;;  %v772_v14 = vadd.f32 %v1732_v7, %v771_v13 }
 0x19c   :  { %v1304_v15 = vpop.f32.mrf.mxu1 }
 0x19d   :  { %1025 = vst.msk [vmem:[%s2059_s5 + $0x8] sm:$0xff] %vm1023_vm2, %v772_v14  ;;  %v793_v16 = vadd.f32 %v1304_v15, %v1732_v7 }
 0x19e   :  { %v784_v17 = vpop.f32.mrf.mxu1 }
 0x19f   :  { %1030 = vst.msk [vmem:[%s2059_s5 + $0x30] sm:$0xff] %vm1023_vm2, %v793_v16  ;;  %v785_v18 = vadd.f32 %v1732_v7, %v784_v17 }
 0x1a0   :  { %v1305_v19 = vpop.f32.mrf.mxu1 }
 0x1a1   :  { %1028 = vst.msk [vmem:[%s2059_s5 + $0x20] sm:$0xff] %vm1023_vm2, %v785_v18  ;;  %v796_v20 = vadd.f32 %v1305_v19, %v1732_v7 }
 0x1a2   :  { %v787_v21 = vpop.f32.mrf.mxu1 }
 0x1a3   :  { %1031 = vst.msk [vmem:[%s2059_s5 + $0x38] sm:$0xff] %vm1023_vm2, %v796_v20  ;;  %v788_v22 = vadd.f32 %v1732_v7, %v787_v21 }
 0x1a4   :  { %v1308_v23 = vpop.f32.mrf.mxu1 }
 0x1a5   :  { %1029 = vst.msk [vmem:[%s2059_s5 + $0x28] sm:$0xff] %vm1023_vm2, %v788_v22  ;;  %v809_v24 = vadd.f32 %v1308_v23, %v1732_v7 }
 0x1a6   :  { %v800_v25 = vpop.f32.mrf.mxu1 }
 0x1a7   :  { %1034 = vst.msk [vmem:[%s2059_s5 + $0x50] sm:$0xff] %vm1023_vm2, %v809_v24  ;;  %v801_v26 = vadd.f32 %v1732_v7, %v800_v25 }
 0x1a8   :  { %v1309_v27 = vpop.f32.mrf.mxu1 }
 0x1a9   :  { %1032 = vst.msk [vmem:[%s2059_s5 + $0x40] sm:$0xff] %vm1023_vm2, %v801_v26  ;;  %v812_v28 = vadd.f32 %v1309_v27, %v1732_v7 }
 0x1aa   :  { %v803_v29 = vpop.f32.mrf.mxu1 }
 0x1ab   :  { %1035 = vst.msk [vmem:[%s2059_s5 + $0x58] sm:$0xff] %vm1023_vm2, %v812_v28  ;;  %v804_v30 = vadd.f32 %v1732_v7, %v803_v29 }
 0x1ac   :  { %v1312_v31 = vpop.f32.mrf.mxu1 }
 0x1ad   :  { %1033 = vst.msk [vmem:[%s2059_s5 + $0x48] sm:$0xff] %vm1023_vm2, %v804_v30  ;;  %v825_v32 = vadd.f32 %v1312_v31, %v1732_v7 }
 0x1ae   :  { %v816_v33 = vpop.f32.mrf.mxu1 }
 0x1af   :  { %1038 = vst.msk [vmem:[%s2059_s5 + $0x70] sm:$0xff] %vm1023_vm2, %v825_v32  ;;  %v817_v34 = vadd.f32 %v1732_v7, %v816_v33 }
 0x1b0   :  { %v1313_v35 = vpop.f32.mrf.mxu1 }
 0x1b1   :  { %1036 = vst.msk [vmem:[%s2059_s5 + $0x60] sm:$0xff] %vm1023_vm2, %v817_v34  ;;  %v828_v36 = vadd.f32 %v1313_v35, %v1732_v7 }
 0x1b2   :  { %v819_v38 = vpop.f32.mrf.mxu1 }
 0x1b3   :  { %1039 = vst.msk [vmem:[%s2059_s5 + $0x78] sm:$0xff] %vm1023_vm2, %v828_v36  ;;  %v820_v39 = vadd.f32 %v1732_v7, %v819_v38 }
 0x1b4   :  { %v1316_v40 = vpop.f32.mrf.mxu1 }
 0x1b5   :  { %1037 = vst.msk [vmem:[%s2059_s5 + $0x68] sm:$0xff] %vm1023_vm2, %v820_v39  ;;  %v841_v41 = vadd.f32 %v1316_v40, %v1732_v7 }
 0x1b6   :  { %v832_v42 = vpop.f32.mrf.mxu1 }
 0x1b7   :  { %1042 = vst.msk [vmem:[%s2059_s5 + $0x90] sm:$0xff] %vm1023_vm2, %v841_v41  ;;  %v833_v43 = vadd.f32 %v1732_v7, %v832_v42 }
 0x1b8   :  { %v1317_v44 = vpop.f32.mrf.mxu1 }
 0x1b9   :  { %1040 = vst.msk [vmem:[%s2059_s5 + $0x80] sm:$0xff] %vm1023_vm2, %v833_v43  ;;  %v844_v45 = vadd.f32 %v1317_v44, %v1732_v7 }
 0x1ba   :  { %v835_v46 = vpop.f32.mrf.mxu1 }
 0x1bb   :  { %1043 = vst.msk [vmem:[%s2059_s5 + $0x98] sm:$0xff] %vm1023_vm2, %v844_v45  ;;  %v836_v47 = vadd.f32 %v1732_v7, %v835_v46 }
 0x1bc   :  { %v1320_v48 = vpop.f32.mrf.mxu1 }
 0x1bd   :  { %1041 = vst.msk [vmem:[%s2059_s5 + $0x88] sm:$0xff] %vm1023_vm2, %v836_v47  ;;  %v857_v49 = vadd.f32 %v1320_v48, %v1732_v7 }
 0x1be   :  { %v848_v50 = vpop.f32.mrf.mxu1 }
 0x1bf   :  { %1046 = vst.msk [vmem:[%s2059_s5 + $0xb0] sm:$0xff] %vm1023_vm2, %v857_v49  ;;  %v849_v51 = vadd.f32 %v1732_v7, %v848_v50 }
 0x1c0   :  { %v1321_v52 = vpop.f32.mrf.mxu1 }
 0x1c1   :  { %1044 = vst.msk [vmem:[%s2059_s5 + $0xa0] sm:$0xff] %vm1023_vm2, %v849_v51  ;;  %v860_v53 = vadd.f32 %v1321_v52, %v1732_v7 }
 0x1c2   :  { %v851_v54 = vpop.f32.mrf.mxu1 }
 0x1c3   :  { %1047 = vst.msk [vmem:[%s2059_s5 + $0xb8] sm:$0xff] %vm1023_vm2, %v860_v53  ;;  %v852_v55 = vadd.f32 %v1732_v7, %v851_v54 }
 0x1c4   :  { %v1324_v56 = vpop.f32.mrf.mxu1 }
 0x1c5   :  { %1045 = vst.msk [vmem:[%s2059_s5 + $0xa8] sm:$0xff] %vm1023_vm2, %v852_v55  ;;  %v873_v57 = vadd.f32 %v1324_v56, %v1732_v7 }
 0x1c6   :  { %v864_v58 = vpop.f32.mrf.mxu1 }
 0x1c7   :  { %1050 = vst.msk [vmem:[%s2059_s5 + $0xd0] sm:$0xff] %vm1023_vm2, %v873_v57  ;;  %v865_v59 = vadd.f32 %v1732_v7, %v864_v58 }
 0x1c8   :  { %v1325_v60 = vpop.f32.mrf.mxu1 }
 0x1c9   :  { %1048 = vst.msk [vmem:[%s2059_s5 + $0xc0] sm:$0xff] %vm1023_vm2, %v865_v59  ;;  %v876_v61 = vadd.f32 %v1325_v60, %v1732_v7 }
 0x1ca   :  { %v867_v62 = vpop.f32.mrf.mxu1 }
 0x1cb   :  { %1051 = vst.msk [vmem:[%s2059_s5 + $0xd8] sm:$0xff] %vm1023_vm2, %v876_v61  ;;  %v868_v63 = vadd.f32 %v1732_v7, %v867_v62 }
 0x1cc   :  { %v1328_v0 = vpop.f32.mrf.mxu1 }
 0x1cd   :  { %1049 = vst.msk [vmem:[%s2059_s5 + $0xc8] sm:$0xff] %vm1023_vm2, %v868_v63  ;;  %v889_v1 = vadd.f32 %v1328_v0, %v1732_v7 }
 0x1ce   :  { %v880_v2 = vpop.f32.mrf.mxu1 }
 0x1cf   :  { %1054 = vst.msk [vmem:[%s2059_s5 + $0xf0] sm:$0xff] %vm1023_vm2, %v889_v1  ;;  %v881_v3 = vadd.f32 %v1732_v7, %v880_v2 }
 0x1d0   :  { %v1329_v4 = vpop.f32.mrf.mxu1 }
 0x1d1   :  { %1052 = vst.msk [vmem:[%s2059_s5 + $0xe0] sm:$0xff] %vm1023_vm2, %v881_v3  ;;  %v892_v5 = vadd.f32 %v1329_v4, %v1732_v7 }
 0x1d2   :  { %v883_v6 = vpop.f32.mrf.mxu1 }
 0x1d3   :  { %1055 = vst.msk [vmem:[%s2059_s5 + $0xf8] sm:$0xff] %vm1023_vm2, %v892_v5  ;;  %v884_v8 = vadd.f32 %v1732_v7, %v883_v6 }
 0x1d4   :  { %v1332_v9 = vpop.f32.mrf.mxu1 }
 0x1d5   :  { %1053 = vst.msk [vmem:[%s2059_s5 + $0xe8] sm:$0xff] %vm1023_vm2, %v884_v8  ;;  %v905_v37 = vadd.f32 %v1332_v9, %v1732_v7 }
 0x1d6   :  { %v896_v10 = vpop.f32.mrf.mxu1 }
 0x1d7   :  { %1058 = vst.msk [vmem:[%s2059_s5 + $0x110] sm:$0xff] %vm1023_vm2, %v905_v37  ;;  %v897_v11 = vadd.f32 %v1732_v7, %v896_v10 }
 0x1d8   :  { %v1333_v12 = vpop.f32.mrf.mxu1 }
 0x1d9   :  { %1056 = vst.msk [vmem:[%s2059_s5 + $0x100] sm:$0xff] %vm1023_vm2, %v897_v11  ;;  %v908_v13 = vadd.f32 %v1333_v12, %v1732_v7 }
 0x1da   :  { %v899_v14 = vpop.f32.mrf.mxu1 }
 0x1db   :  { %1059 = vst.msk [vmem:[%s2059_s5 + $0x118] sm:$0xff] %vm1023_vm2, %v908_v13  ;;  %v900_v15 = vadd.f32 %v1732_v7, %v899_v14 }
 0x1dc   :  { %v1336_v16 = vpop.f32.mrf.mxu1 }
 0x1dd   :  { %1057 = vst.msk [vmem:[%s2059_s5 + $0x108] sm:$0xff] %vm1023_vm2, %v900_v15  ;;  %v921_v17 = vadd.f32 %v1336_v16, %v1732_v7 }
 0x1de   :  { %v912_v18 = vpop.f32.mrf.mxu1 }
 0x1df   :  { %1062 = vst.msk [vmem:[%s2059_s5 + $0x130] sm:$0xff] %vm1023_vm2, %v921_v17  ;;  %v913_v19 = vadd.f32 %v1732_v7, %v912_v18 }
 0x1e0   :  { %v1337_v20 = vpop.f32.mrf.mxu1 }
 0x1e1   :  { %1060 = vst.msk [vmem:[%s2059_s5 + $0x120] sm:$0xff] %vm1023_vm2, %v913_v19  ;;  %v924_v21 = vadd.f32 %v1337_v20, %v1732_v7 }
 0x1e2   :  { %v915_v22 = vpop.f32.mrf.mxu1 }
 0x1e3   :  { %1063 = vst.msk [vmem:[%s2059_s5 + $0x138] sm:$0xff] %vm1023_vm2, %v924_v21  ;;  %v916_v23 = vadd.f32 %v1732_v7, %v915_v22 }
 0x1e4   :  { %v1340_v24 = vpop.f32.mrf.mxu1 }
 0x1e5   :  { %1061 = vst.msk [vmem:[%s2059_s5 + $0x128] sm:$0xff] %vm1023_vm2, %v916_v23  ;;  %v937_v25 = vadd.f32 %v1340_v24, %v1732_v7 }
 0x1e6   :  { %v928_v26 = vpop.f32.mrf.mxu1 }
 0x1e7   :  { %1066 = vst.msk [vmem:[%s2059_s5 + $0x150] sm:$0xff] %vm1023_vm2, %v937_v25  ;;  %v929_v27 = vadd.f32 %v1732_v7, %v928_v26 }
 0x1e8   :  { %v1341_v28 = vpop.f32.mrf.mxu1 }
 0x1e9   :  { %1064 = vst.msk [vmem:[%s2059_s5 + $0x140] sm:$0xff] %vm1023_vm2, %v929_v27  ;;  %v940_v29 = vadd.f32 %v1341_v28, %v1732_v7 }
 0x1ea   :  { %v931_v30 = vpop.f32.mrf.mxu1 }
 0x1eb   :  { %1067 = vst.msk [vmem:[%s2059_s5 + $0x158] sm:$0xff] %vm1023_vm2, %v940_v29  ;;  %v932_v31 = vadd.f32 %v1732_v7, %v931_v30 }
 0x1ec   :  { %v1344_v32 = vpop.f32.mrf.mxu1 }
 0x1ed   :  { %1065 = vst.msk [vmem:[%s2059_s5 + $0x148] sm:$0xff] %vm1023_vm2, %v932_v31  ;;  %v953_v33 = vadd.f32 %v1344_v32, %v1732_v7 }
 0x1ee   :  { %v944_v34 = vpop.f32.mrf.mxu1 }
 0x1ef   :  { %1070 = vst.msk [vmem:[%s2059_s5 + $0x170] sm:$0xff] %vm1023_vm2, %v953_v33  ;;  %v945_v35 = vadd.f32 %v1732_v7, %v944_v34 }
 0x1f0   :  { %v1345_v36 = vpop.f32.mrf.mxu1 }
 0x1f1   :  { %1068 = vst.msk [vmem:[%s2059_s5 + $0x160] sm:$0xff] %vm1023_vm2, %v945_v35  ;;  %v956_v38 = vadd.f32 %v1345_v36, %v1732_v7 }
 0x1f2   :  { %v947_v39 = vpop.f32.mrf.mxu1 }
 0x1f3   :  { %1071 = vst.msk [vmem:[%s2059_s5 + $0x178] sm:$0xff] %vm1023_vm2, %v956_v38  ;;  %v948_v40 = vadd.f32 %v1732_v7, %v947_v39 }
 0x1f4   :  { %v1348_v41 = vpop.f32.mrf.mxu1 }
 0x1f5   :  { %1069 = vst.msk [vmem:[%s2059_s5 + $0x168] sm:$0xff] %vm1023_vm2, %v948_v40  ;;  %v969_v42 = vadd.f32 %v1348_v41, %v1732_v7 }
 0x1f6   :  { %v960_v43 = vpop.f32.mrf.mxu1 }
 0x1f7   :  { %1074 = vst.msk [vmem:[%s2059_s5 + $0x190] sm:$0xff] %vm1023_vm2, %v969_v42  ;;  %v961_v44 = vadd.f32 %v1732_v7, %v960_v43 }
 0x1f8   :  { %v1349_v45 = vpop.f32.mrf.mxu1 }
 0x1f9   :  { %1072 = vst.msk [vmem:[%s2059_s5 + $0x180] sm:$0xff] %vm1023_vm2, %v961_v44  ;;  %v972_v46 = vadd.f32 %v1349_v45, %v1732_v7 }
 0x1fa   :  { %v963_v47 = vpop.f32.mrf.mxu1 }
 0x1fb   :  { %1075 = vst.msk [vmem:[%s2059_s5 + $0x198] sm:$0xff] %vm1023_vm2, %v972_v46  ;;  %v964_v48 = vadd.f32 %v1732_v7, %v963_v47 }
 0x1fc   :  { %v1352_v49 = vpop.f32.mrf.mxu1 }
 0x1fd   :  { %1073 = vst.msk [vmem:[%s2059_s5 + $0x188] sm:$0xff] %vm1023_vm2, %v964_v48  ;;  %v985_v50 = vadd.f32 %v1352_v49, %v1732_v7 }
 0x1fe   :  { %v976_v51 = vpop.f32.mrf.mxu1 }
 0x1ff   :  { %1078 = vst.msk [vmem:[%s2059_s5 + $0x1b0] sm:$0xff] %vm1023_vm2, %v985_v50  ;;  %v977_v52 = vadd.f32 %v1732_v7, %v976_v51 }
 0x200   :  { %v1353_v53 = vpop.f32.mrf.mxu1 }
 0x201   :  { %1076 = vst.msk [vmem:[%s2059_s5 + $0x1a0] sm:$0xff] %vm1023_vm2, %v977_v52  ;;  %v988_v54 = vadd.f32 %v1353_v53, %v1732_v7 }
 0x202   :  { %v979_v55 = vpop.f32.mrf.mxu1 }
 0x203   :  { %1079 = vst.msk [vmem:[%s2059_s5 + $0x1b8] sm:$0xff] %vm1023_vm2, %v988_v54  ;;  %v980_v56 = vadd.f32 %v1732_v7, %v979_v55 }
 0x204   :  { %v1356_v57 = vpop.f32.mrf.mxu1 }
 0x205   :  { %1077 = vst.msk [vmem:[%s2059_s5 + $0x1a8] sm:$0xff] %vm1023_vm2, %v980_v56  ;;  %v1001_v58 = vadd.f32 %v1356_v57, %v1732_v7 }
 0x206   :  { %v992_v59 = vpop.f32.mrf.mxu1 }
 0x207   :  { %1082 = vst.msk [vmem:[%s2059_s5 + $0x1d0] sm:$0xff] %vm1023_vm2, %v1001_v58  ;;  %v993_v60 = vadd.f32 %v1732_v7, %v992_v59 }
 0x208   :  { %v1357_v61 = vpop.f32.mrf.mxu1 }
 0x209   :  { %1080 = vst.msk [vmem:[%s2059_s5 + $0x1c0] sm:$0xff] %vm1023_vm2, %v993_v60  ;;  %v1004_v62 = vadd.f32 %v1357_v61, %v1732_v7 }
 0x20a   :  { %v995_v63 = vpop.f32.mrf.mxu1 }
 0x20b   :  { %1083 = vst.msk [vmem:[%s2059_s5 + $0x1d8] sm:$0xff] %vm1023_vm2, %v1004_v62  ;;  %v996_v0 = vadd.f32 %v1732_v7, %v995_v63 }
 0x20c   :  { %v1360_v1 = vpop.f32.mrf.mxu1 }
 0x20d   :  { %1081 = vst.msk [vmem:[%s2059_s5 + $0x1c8] sm:$0xff] %vm1023_vm2, %v996_v0  ;;  %v1017_v2 = vadd.f32 %v1360_v1, %v1732_v7 }
 0x20e   :  { %v1008_v3 = vpop.f32.mrf.mxu1 }
 0x20f   :  { %1086 = vst.msk [vmem:[%s2059_s5 + $0x1f0] sm:$0xff] %vm1023_vm2, %v1017_v2  ;;  %v1009_v4 = vadd.f32 %v1732_v7, %v1008_v3 }
 0x210   :  { %v1361_v5 = vpop.f32.mrf.mxu1 }
 0x211   :  { %1084 = vst.msk [vmem:[%s2059_s5 + $0x1e0] sm:$0xff] %vm1023_vm2, %v1009_v4  ;;  %v1020_v6 = vadd.f32 %v1361_v5, %v1732_v7 }
 0x212   :  { %v1011_v8 = vpop.f32.mrf.mxu1 }
 0x213   :  { %1087 = vst.msk [vmem:[%s2059_s5 + $0x1f8] sm:$0xff] %vm1023_vm2, %v1020_v6  ;;  %v1012_v9 = vadd.f32 %v1732_v7, %v1011_v8 }
 0x215   :  { %1085 = vst.msk [vmem:[%s2059_s5 + $0x1e8] sm:$0xff] %vm1023_vm2, %v1012_v9 }

</bundles_post_ra>
